<compile_context>
chip_gen: v7x
topology: tpu7x:2x2x1
jax: 0.10.0
libtpu: 0.0.40
codegen_flags: <defaults>
</compile_context>

<pallas_src>
import jax
import jax.numpy as jnp
import numpy as np
from jax import lax
from jax.experimental import pallas as pl
from jax.experimental.pallas import tpu as pltpu


def _round_up(x, m):
    return ((x + m - 1) // m) * m


def gru_rnn_kernel(maxlen_ref,            # SMEM (1,) int32  (scalar prefetch)
                   gi_ref,                # VMEM (Tc, 3, Bb, Hp) f32  precomputed input proj
                   len_ref,               # VMEM (Bb, 1) int32
                   whh_ref,               # VMEM (3, Hp, Hp) compute_dtype, gate-major
                   bhn_ref,               # VMEM (1, Hp) f32, n-gate hidden bias
                   o_ref,                 # VMEM (Bb, Hp) f32
                   h_scratch):            # VMEM (Bb, Hp) f32, persists across time blocks
    tb = pl.program_id(1)                 # time-block index (inner, "arbitrary")
    n_tb = pl.num_programs(1)
    Tc = gi_ref.shape[0]

    @pl.when(tb == 0)
    def _init():
        h_scratch[...] = jnp.zeros_like(h_scratch)

    # Skip whole time blocks past max(lengths): no MXU/VPU work for dead tail.
    @pl.when(tb * Tc < maxlen_ref[0])
    def _body():
        len_col = len_ref[...]            # (Bb, 1) int32
        bhn = bhn_ref[...]                # (1, Hp) f32
        t_base = tb * Tc

        def step(s, h):
            g = gi_ref[s]                 # (3, Bb, Hp) f32 (biases already folded)
            hc = h.astype(whh_ref.dtype)
            hr = jnp.dot(hc, whh_ref[0], preferred_element_type=jnp.float32)
            hz = jnp.dot(hc, whh_ref[1], preferred_element_type=jnp.float32)
            hn = jnp.dot(hc, whh_ref[2], preferred_element_type=jnp.float32)
            r = jax.nn.sigmoid(g[0] + hr)
            z = jax.nn.sigmoid(g[1] + hz)
            n = jnp.tanh(g[2] + r * (hn + bhn))   # b_hh_n must stay inside r*(...)
            h_new = (1.0 - z) * n + z * h
            # pack_padded_sequence semantics: only update while t < lengths[i].
            valid = len_col > (t_base + s)        # (Bb, 1) bool
            return jnp.where(valid, h_new, h)

        h_scratch[...] = lax.fori_loop(0, Tc, step, h_scratch[...], unroll=True)

    @pl.when(tb == n_tb - 1)
    def _finalize():
        o_ref[...] = h_scratch[...].astype(o_ref.dtype)


def gru_encoder_forward(his_vectors, lengths, params, *,
                        time_block=8, batch_block=8,
                        compute_dtype=jnp.float32):
    """his_vectors: (B, T, E) float32 (batch-first, as in PyTorch).
       lengths:     (B,) int32, each >= 1.
       returns:     (B, E) float32 final hidden states."""
    w_ih, w_hh, b_ih, b_hh = params       # (E,3H), (H,3H), (3H,), (3H,)
    B, T, E = his_vectors.shape
    H = E

    LANE, SUB = 128, 8
    Hp = _round_up(H, LANE)
    Bp = _round_up(B, SUB)
    Bb = max(SUB, (min(batch_block, Bp) // SUB) * SUB)
    Bp = _round_up(Bp, Bb)
    nb = Bp // Bb
    Tc = max(1, int(time_block))
    T_pad = _round_up(T, Tc)
    ntb = T_pad // Tc

    x = his_vectors.astype(jnp.float32)

    # --- Hoisted input projection (one big matmul outside the recurrence). ---
    # Fold b_ih fully and the r/z parts of b_hh; keep b_hh_n separate.
    b_fold = jnp.concatenate([b_ih[:H] + b_hh[:H],
                              b_ih[H:2 * H] + b_hh[H:2 * H],
                              b_ih[2 * H:]])
    gi = jnp.einsum('bte,eg->btg', x, w_ih) + b_fold          # (B, T, 3H) f32
    gi = gi.reshape(B, T, 3, H)
    gi = jnp.pad(gi, ((0, Bp - B), (0, T_pad - T), (0, 0), (0, Hp - H)))
    gi = jnp.transpose(gi, (1, 2, 0, 3))                      # (T_pad, 3, Bp, Hp)

    # --- Gate-major, lane-padded recurrent weight and n-gate hidden bias. ---
    whh_g = jnp.stack([w_hh[:, :H], w_hh[:, H:2 * H], w_hh[:, 2 * H:]], axis=0)
    whh_g = jnp.pad(whh_g, ((0, 0), (0, Hp - H), (0, Hp - H))).astype(compute_dtype)
    bhn = jnp.pad(b_hh[2 * H:], (0, Hp - H)).reshape(1, Hp).astype(jnp.float32)

    len_col = jnp.pad(lengths.astype(jnp.int32), (0, Bp - B)).reshape(Bp, 1)
    max_len = jnp.max(lengths).astype(jnp.int32).reshape(1)   # scalar prefetch

    out = pl.pallas_call(
        gru_rnn_kernel,
        out_shape=jax.ShapeDtypeStruct((Bp, Hp), jnp.float32),
        grid_spec=pltpu.PrefetchScalarGridSpec(
            num_scalar_prefetch=1,
            grid=(nb, ntb),
            in_specs=[
                pl.BlockSpec((Tc, 3, Bb, Hp), lambda b, t, ml: (t, 0, b, 0)),
                pl.BlockSpec((Bb, 1), lambda b, t, ml: (b, 0)),
                pl.BlockSpec((3, Hp, Hp), lambda b, t, ml: (0, 0, 0)),
                pl.BlockSpec((1, Hp), lambda b, t, ml: (0, 0)),
            ],
            out_specs=pl.BlockSpec((Bb, Hp), lambda b, t, ml: (b, 0)),
            scratch_shapes=[pltpu.VMEM((Bb, Hp), jnp.float32)],
        ),
        compiler_params=pltpu.CompilerParams(
            dimension_semantics=("parallel", "arbitrary"),
            vmem_limit_bytes=32 * 1024 * 1024,
        ),
    )(max_len, gi, len_col, whh_g, bhn)

    return out[:B, :H]


def init_gru_params(emb_size, key):
    """nn.GRU-shaped params: weight_ih (3H,E), weight_hh (3H,H), biases (3H,).
    Stored transposed for right-multiplication on the MXU."""
    H = emb_size
    k = 1.0 / np.sqrt(H)
    k1, k2, k3, k4 = jax.random.split(key, 4)
    w_ih = jax.random.uniform(k1, (3 * H, emb_size), jnp.float32, -k, k)
    w_hh = jax.random.uniform(k2, (3 * H, H), jnp.float32, -k, k)
    b_ih = jax.random.uniform(k3, (3 * H,), jnp.float32, -k, k)
    b_hh = jax.random.uniform(k4, (3 * H,), jnp.float32, -k, k)
    return (w_ih.T, w_hh.T, b_ih, b_hh)


def gru_encoder_ref(his_vectors, lengths, params):
    """Pure-JAX reference of the PyTorch semantics (for checking)."""
    w_ih, w_hh, b_ih, b_hh = params
    B, T, E = his_vectors.shape
    H = E
    h = jnp.zeros((B, H), jnp.float32)
    for t in range(T):
        x_t = his_vectors[:, t, :].astype(jnp.float32)
        gi = x_t @ w_ih + b_ih
        gh = h @ w_hh + b_hh
        r = jax.nn.sigmoid(gi[:, :H] + gh[:, :H])
        z = jax.nn.sigmoid(gi[:, H:2 * H] + gh[:, H:2 * H])
        n = jnp.tanh(gi[:, 2 * H:] + r * gh[:, 2 * H:])
        h_new = (1.0 - z) * n + z * h
        h = jnp.where((lengths > t).reshape(B, 1), h_new, h)
    return h


if __name__ == "__main__":
    key = jax.random.PRNGKey(0)

    # Test 1: small shapes matching the module (batch=2, seq=8, emb=32).
    B, T, E = 2, 8, 32
    k_x, k_p, k_x2 = jax.random.split(key, 3)
    his_vectors = jax.random.normal(k_x, (B, T, E), jnp.float32)
    lengths = jnp.array([8, 5], dtype=jnp.int32)
    params = init_gru_params(E, k_p)

    out = gru_encoder_forward(his_vectors, lengths, params)
    out = jax.block_until_ready(out)
    ref = gru_encoder_ref(his_vectors, lengths, params)
    np.testing.assert_allclose(np.asarray(out), np.asarray(ref), rtol=1e-4, atol=1e-5)

    # Test 2: exercises time-blocking, padding and dead-tail-block skipping.
    B2, T2 = 3, 20
    his2 = jax.random.normal(k_x2, (B2, T2, E), jnp.float32)
    len2 = jnp.array([20, 11, 1], dtype=jnp.int32)
    out2 = jax.block_until_ready(gru_encoder_forward(his2, len2, params, time_block=8))
    ref2 = gru_encoder_ref(his2, len2, params)
    np.testing.assert_allclose(np.asarray(out2), np.asarray(ref2), rtol=1e-4, atol=1e-5)

    print("KERNEL_OK")
</pallas_src>

<mosaic_0001>
module attributes {stable_mosaic.version = 11 : i64} {
  func.func @gru_rnn_kernel(%arg0: i32, %arg1: i32, %arg2: memref<1xi32, #tpu.memory_space<smem>>, %arg3: memref<8x3x8x128xf32, #tpu.memory_space<vmem>>, %arg4: memref<8x1xi32, #tpu.memory_space<vmem>>, %arg5: memref<3x128x128xf32, #tpu.memory_space<vmem>>, %arg6: memref<1x128xf32, #tpu.memory_space<vmem>>, %arg7: memref<8x128xf32, #tpu.memory_space<vmem>>, %arg8: memref<8x128xf32, #tpu.memory_space<vmem>>) attributes {dimension_semantics = [#tpu.dimension_semantics<parallel>, #tpu.dimension_semantics<arbitrary>], iteration_bounds = array<i64: 1, 1>, scalar_prefetch = 1 : i64, scratch_operands = 1 : i64, tpu.core_type = #tpu.core_type<tc>, window_params = [{transform_indices = @transform_0, window_bounds = array<i64: 8, 3, 8, 128>}, {transform_indices = @transform_1, window_bounds = array<i64: 8, 1>}, {pipeline_mode = #tpu.pipeline_mode<synchronous>, transform_indices = @transform_2, window_bounds = array<i64: 3, 128, 128>}, {pipeline_mode = #tpu.pipeline_mode<synchronous>, transform_indices = @transform_3, window_bounds = array<i64: 1, 128>}, {transform_indices = @transform_4, window_bounds = array<i64: 8, 128>}]} {
    %c0_i32 = arith.constant 0 : i32
    %0 = arith.cmpi eq, %arg1, %c0_i32 : i32
    %1 = arith.extui %0 : i1 to i32
    %c0_i32_0 = arith.constant 0 : i32
    %2 = arith.cmpi ne, %1, %c0_i32_0 : i32
    scf.if %2 {
      %cst = arith.constant 0.000000e+00 : f32
      %11 = vector.broadcast %cst : f32 to vector<8x128xf32>
      %c0_4 = arith.constant 0 : index
      %c0_5 = arith.constant 0 : index
      %12 = vector.load %arg8[%c0_4, %c0_5] : memref<8x128xf32, #tpu.memory_space<vmem>>, vector<8x128xf32>
      tpu.vector_store %arg8[%c0_4, %c0_5], %11 {strides = array<i32>} : memref<8x128xf32, #tpu.memory_space<vmem>>, vector<8x128xf32>,
    } else {
    }
    %c8_i32 = arith.constant 8 : i32
    %3 = arith.muli %arg1, %c8_i32 : i32
    %c0 = arith.constant 0 : index
    %4 = memref.load %arg2[%c0] : memref<1xi32, #tpu.memory_space<smem>>
    %5 = arith.cmpi slt, %3, %4 : i32
    %6 = arith.extui %5 : i1 to i32
    %c0_i32_1 = arith.constant 0 : i32
    %7 = arith.cmpi ne, %6, %c0_i32_1 : i32
    scf.if %7 {
      %c0_4 = arith.constant 0 : index
      %c0_5 = arith.constant 0 : index
      %11 = vector.load %arg4[%c0_4, %c0_5] : memref<8x1xi32, #tpu.memory_space<vmem>>, vector<8x1xi32>
      %c0_6 = arith.constant 0 : index
      %c0_7 = arith.constant 0 : index
      %12 = vector.load %arg6[%c0_6, %c0_7] : memref<1x128xf32, #tpu.memory_space<vmem>>, vector<1x128xf32>
      %c8_i32_8 = arith.constant 8 : i32
      %13 = arith.muli %arg1, %c8_i32_8 : i32
      %c0_9 = arith.constant 0 : index
      %c0_10 = arith.constant 0 : index
      %14 = vector.load %arg8[%c0_9, %c0_10] : memref<8x128xf32, #tpu.memory_space<vmem>>, vector<8x128xf32>
      %c0_i32_11 = arith.constant 0 : i32
      %15 = arith.index_cast %c0_i32_11 : i32 to index
      %c0_12 = arith.constant 0 : index
      %c0_13 = arith.constant 0 : index
      %c0_14 = arith.constant 0 : index
      %16 = vector.load %arg3[%15, %c0_12, %c0_13, %c0_14] : memref<8x3x8x128xf32, #tpu.memory_space<vmem>>, vector<1x3x8x128xf32>
      %17 = vector.shape_cast %16 : vector<1x3x8x128xf32> to vector<3x8x128xf32>
      %c0_15 = arith.constant 0 : index
      %c0_16 = arith.constant 0 : index
      %c0_17 = arith.constant 0 : index
      %18 = vector.load %arg5[%c0_15, %c0_16, %c0_17] : memref<3x128x128xf32, #tpu.memory_space<vmem>>, vector<1x128x128xf32>
      %19 = vector.shape_cast %18 : vector<1x128x128xf32> to vector<128x128xf32>
      %cst = arith.constant dense<0.000000e+00> : vector<8x128xf32>
      %20 = tpu.matmul %14, %19, %cst {dimension_numbers = #tpu.dot_dimension_numbers<[1], [0], [0], [1], [0, 0, 1, 1], [], []>} : vector<8x128xf32>, vector<128x128xf32>, vector<8x128xf32> -> vector<8x128xf32>
      %c1 = arith.constant 1 : index
      %c0_18 = arith.constant 0 : index
      %c0_19 = arith.constant 0 : index
      %21 = vector.load %arg5[%c1, %c0_18, %c0_19] : memref<3x128x128xf32, #tpu.memory_space<vmem>>, vector<1x128x128xf32>
      %22 = vector.shape_cast %21 : vector<1x128x128xf32> to vector<128x128xf32>
      %cst_20 = arith.constant dense<0.000000e+00> : vector<8x128xf32>
      %23 = tpu.matmul %14, %22, %cst_20 {dimension_numbers = #tpu.dot_dimension_numbers<[1], [0], [0], [1], [0, 0, 1, 1], [], []>} : vector<8x128xf32>, vector<128x128xf32>, vector<8x128xf32> -> vector<8x128xf32>
      %c2 = arith.constant 2 : index
      %c0_21 = arith.constant 0 : index
      %c0_22 = arith.constant 0 : index
      %24 = vector.load %arg5[%c2, %c0_21, %c0_22] : memref<3x128x128xf32, #tpu.memory_space<vmem>>, vector<1x128x128xf32>
      %25 = vector.shape_cast %24 : vector<1x128x128xf32> to vector<128x128xf32>
      %cst_23 = arith.constant dense<0.000000e+00> : vector<8x128xf32>
      %26 = tpu.matmul %14, %25, %cst_23 {dimension_numbers = #tpu.dot_dimension_numbers<[1], [0], [0], [1], [0, 0, 1, 1], [], []>} : vector<8x128xf32>, vector<128x128xf32>, vector<8x128xf32> -> vector<8x128xf32>
      %27 = vector.extract_strided_slice %17 {offsets = [0, 0, 0], sizes = [1, 8, 128], strides = [1, 1, 1]} : vector<3x8x128xf32> to vector<1x8x128xf32>
      %28 = vector.shape_cast %27 : vector<1x8x128xf32> to vector<8x128xf32>
      %29 = arith.addf %28, %20 : vector<8x128xf32>
      %30 = arith.negf %29 : vector<8x128xf32>
      %31 = math.exp %30 : vector<8x128xf32>
      %cst_24 = arith.constant 1.000000e+00 : f32
      %32 = vector.broadcast %cst_24 : f32 to vector<8x128xf32>
      %33 = arith.addf %32, %31 : vector<8x128xf32>
      %34 = arith.divf %32, %33 : vector<8x128xf32>
      %35 = vector.extract_strided_slice %17 {offsets = [1, 0, 0], sizes = [1, 8, 128], strides = [1, 1, 1]} : vector<3x8x128xf32> to vector<1x8x128xf32>
      %36 = vector.shape_cast %35 : vector<1x8x128xf32> to vector<8x128xf32>
      %37 = arith.addf %36, %23 : vector<8x128xf32>
      %38 = arith.negf %37 : vector<8x128xf32>
      %39 = math.exp %38 : vector<8x128xf32>
      %cst_25 = arith.constant 1.000000e+00 : f32
      %40 = vector.broadcast %cst_25 : f32 to vector<8x128xf32>
      %41 = arith.addf %40, %39 : vector<8x128xf32>
      %42 = arith.divf %40, %41 : vector<8x128xf32>
      %43 = vector.extract_strided_slice %17 {offsets = [2, 0, 0], sizes = [1, 8, 128], strides = [1, 1, 1]} : vector<3x8x128xf32> to vector<1x8x128xf32>
      %44 = vector.shape_cast %43 : vector<1x8x128xf32> to vector<8x128xf32>
      %45 = vector.broadcast %12 : vector<1x128xf32> to vector<8x128xf32>
      %46 = arith.addf %26, %45 : vector<8x128xf32>
      %47 = arith.mulf %34, %46 : vector<8x128xf32>
      %48 = arith.addf %44, %47 : vector<8x128xf32>
      %49 = math.tanh %48 : vector<8x128xf32>
      %cst_26 = arith.constant 1.000000e+00 : f32
      %50 = vector.broadcast %cst_26 : f32 to vector<8x128xf32>
      %51 = arith.subf %50, %42 : vector<8x128xf32>
      %52 = arith.mulf %51, %49 : vector<8x128xf32>
      %53 = arith.mulf %42, %14 : vector<8x128xf32>
      %54 = arith.addf %52, %53 : vector<8x128xf32>
      %55 = arith.addi %13, %c0_i32_11 : i32
      %56 = vector.broadcast %55 : i32 to vector<8x1xi32>
      %57 = arith.cmpi sgt, %11, %56 : vector<8x1xi32>
      %58 = vector.shape_cast %57 : vector<8x1xi1> to vector<8x1xi1>
      %59 = vector.broadcast %58 : vector<8x1xi1> to vector<8x128xi1>
      %60 = arith.select %59, %54, %14 : vector<8x128xi1>, vector<8x128xf32>
      %c1_i32 = arith.constant 1 : i32
      %61 = arith.index_cast %c1_i32 : i32 to index
      %c0_27 = arith.constant 0 : index
      %c0_28 = arith.constant 0 : index
      %c0_29 = arith.constant 0 : index
      %62 = vector.load %arg3[%61, %c0_27, %c0_28, %c0_29] : memref<8x3x8x128xf32, #tpu.memory_space<vmem>>, vector<1x3x8x128xf32>
      %63 = vector.shape_cast %62 : vector<1x3x8x128xf32> to vector<3x8x128xf32>
      %c0_30 = arith.constant 0 : index
      %c0_31 = arith.constant 0 : index
      %c0_32 = arith.constant 0 : index
      %64 = vector.load %arg5[%c0_30, %c0_31, %c0_32] : memref<3x128x128xf32, #tpu.memory_space<vmem>>, vector<1x128x128xf32>
      %65 = vector.shape_cast %64 : vector<1x128x128xf32> to vector<128x128xf32>
      %cst_33 = arith.constant dense<0.000000e+00> : vector<8x128xf32>
      %66 = tpu.matmul %60, %65, %cst_33 {dimension_numbers = #tpu.dot_dimension_numbers<[1], [0], [0], [1], [0, 0, 1, 1], [], []>} : vector<8x128xf32>, vector<128x128xf32>, vector<8x128xf32> -> vector<8x128xf32>
      %c1_34 = arith.constant 1 : index
      %c0_35 = arith.constant 0 : index
      %c0_36 = arith.constant 0 : index
      %67 = vector.load %arg5[%c1_34, %c0_35, %c0_36] : memref<3x128x128xf32, #tpu.memory_space<vmem>>, vector<1x128x128xf32>
      %68 = vector.shape_cast %67 : vector<1x128x128xf32> to vector<128x128xf32>
      %cst_37 = arith.constant dense<0.000000e+00> : vector<8x128xf32>
      %69 = tpu.matmul %60, %68, %cst_37 {dimension_numbers = #tpu.dot_dimension_numbers<[1], [0], [0], [1], [0, 0, 1, 1], [], []>} : vector<8x128xf32>, vector<128x128xf32>, vector<8x128xf32> -> vector<8x128xf32>
      %c2_38 = arith.constant 2 : index
      %c0_39 = arith.constant 0 : index
      %c0_40 = arith.constant 0 : index
      %70 = vector.load %arg5[%c2_38, %c0_39, %c0_40] : memref<3x128x128xf32, #tpu.memory_space<vmem>>, vector<1x128x128xf32>
      %71 = vector.shape_cast %70 : vector<1x128x128xf32> to vector<128x128xf32>
      %cst_41 = arith.constant dense<0.000000e+00> : vector<8x128xf32>
      %72 = tpu.matmul %60, %71, %cst_41 {dimension_numbers = #tpu.dot_dimension_numbers<[1], [0], [0], [1], [0, 0, 1, 1], [], []>} : vector<8x128xf32>, vector<128x128xf32>, vector<8x128xf32> -> vector<8x128xf32>
      %73 = vector.extract_strided_slice %63 {offsets = [0, 0, 0], sizes = [1, 8, 128], strides = [1, 1, 1]} : vector<3x8x128xf32> to vector<1x8x128xf32>
      %74 = vector.shape_cast %73 : vector<1x8x128xf32> to vector<8x128xf32>
      %75 = arith.addf %74, %66 : vector<8x128xf32>
      %76 = arith.negf %75 : vector<8x128xf32>
      %77 = math.exp %76 : vector<8x128xf32>
      %cst_42 = arith.constant 1.000000e+00 : f32
      %78 = vector.broadcast %cst_42 : f32 to vector<8x128xf32>
      %79 = arith.addf %78, %77 : vector<8x128xf32>
      %80 = arith.divf %78, %79 : vector<8x128xf32>
      %81 = vector.extract_strided_slice %63 {offsets = [1, 0, 0], sizes = [1, 8, 128], strides = [1, 1, 1]} : vector<3x8x128xf32> to vector<1x8x128xf32>
      %82 = vector.shape_cast %81 : vector<1x8x128xf32> to vector<8x128xf32>
      %83 = arith.addf %82, %69 : vector<8x128xf32>
      %84 = arith.negf %83 : vector<8x128xf32>
      %85 = math.exp %84 : vector<8x128xf32>
      %cst_43 = arith.constant 1.000000e+00 : f32
      %86 = vector.broadcast %cst_43 : f32 to vector<8x128xf32>
      %87 = arith.addf %86, %85 : vector<8x128xf32>
      %88 = arith.divf %86, %87 : vector<8x128xf32>
      %89 = vector.extract_strided_slice %63 {offsets = [2, 0, 0], sizes = [1, 8, 128], strides = [1, 1, 1]} : vector<3x8x128xf32> to vector<1x8x128xf32>
      %90 = vector.shape_cast %89 : vector<1x8x128xf32> to vector<8x128xf32>
      %91 = vector.broadcast %12 : vector<1x128xf32> to vector<8x128xf32>
      %92 = arith.addf %72, %91 : vector<8x128xf32>
      %93 = arith.mulf %80, %92 : vector<8x128xf32>
      %94 = arith.addf %90, %93 : vector<8x128xf32>
      %95 = math.tanh %94 : vector<8x128xf32>
      %cst_44 = arith.constant 1.000000e+00 : f32
      %96 = vector.broadcast %cst_44 : f32 to vector<8x128xf32>
      %97 = arith.subf %96, %88 : vector<8x128xf32>
      %98 = arith.mulf %97, %95 : vector<8x128xf32>
      %99 = arith.mulf %88, %60 : vector<8x128xf32>
      %100 = arith.addf %98, %99 : vector<8x128xf32>
      %101 = arith.addi %13, %c1_i32 : i32
      %102 = vector.broadcast %101 : i32 to vector<8x1xi32>
      %103 = arith.cmpi sgt, %11, %102 : vector<8x1xi32>
      %104 = vector.shape_cast %103 : vector<8x1xi1> to vector<8x1xi1>
      %105 = vector.broadcast %104 : vector<8x1xi1> to vector<8x128xi1>
      %106 = arith.select %105, %100, %60 : vector<8x128xi1>, vector<8x128xf32>
      %c2_i32 = arith.constant 2 : i32
      %107 = arith.index_cast %c2_i32 : i32 to index
      %c0_45 = arith.constant 0 : index
      %c0_46 = arith.constant 0 : index
      %c0_47 = arith.constant 0 : index
      %108 = vector.load %arg3[%107, %c0_45, %c0_46, %c0_47] : memref<8x3x8x128xf32, #tpu.memory_space<vmem>>, vector<1x3x8x128xf32>
      %109 = vector.shape_cast %108 : vector<1x3x8x128xf32> to vector<3x8x128xf32>
      %c0_48 = arith.constant 0 : index
      %c0_49 = arith.constant 0 : index
      %c0_50 = arith.constant 0 : index
      %110 = vector.load %arg5[%c0_48, %c0_49, %c0_50] : memref<3x128x128xf32, #tpu.memory_space<vmem>>, vector<1x128x128xf32>
      %111 = vector.shape_cast %110 : vector<1x128x128xf32> to vector<128x128xf32>
      %cst_51 = arith.constant dense<0.000000e+00> : vector<8x128xf32>
      %112 = tpu.matmul %106, %111, %cst_51 {dimension_numbers = #tpu.dot_dimension_numbers<[1], [0], [0], [1], [0, 0, 1, 1], [], []>} : vector<8x128xf32>, vector<128x128xf32>, vector<8x128xf32> -> vector<8x128xf32>
      %c1_52 = arith.constant 1 : index
      %c0_53 = arith.constant 0 : index
      %c0_54 = arith.constant 0 : index
      %113 = vector.load %arg5[%c1_52, %c0_53, %c0_54] : memref<3x128x128xf32, #tpu.memory_space<vmem>>, vector<1x128x128xf32>
      %114 = vector.shape_cast %113 : vector<1x128x128xf32> to vector<128x128xf32>
      %cst_55 = arith.constant dense<0.000000e+00> : vector<8x128xf32>
      %115 = tpu.matmul %106, %114, %cst_55 {dimension_numbers = #tpu.dot_dimension_numbers<[1], [0], [0], [1], [0, 0, 1, 1], [], []>} : vector<8x128xf32>, vector<128x128xf32>, vector<8x128xf32> -> vector<8x128xf32>
      %c2_56 = arith.constant 2 : index
      %c0_57 = arith.constant 0 : index
      %c0_58 = arith.constant 0 : index
      %116 = vector.load %arg5[%c2_56, %c0_57, %c0_58] : memref<3x128x128xf32, #tpu.memory_space<vmem>>, vector<1x128x128xf32>
      %117 = vector.shape_cast %116 : vector<1x128x128xf32> to vector<128x128xf32>
      %cst_59 = arith.constant dense<0.000000e+00> : vector<8x128xf32>
      %118 = tpu.matmul %106, %117, %cst_59 {dimension_numbers = #tpu.dot_dimension_numbers<[1], [0], [0], [1], [0, 0, 1, 1], [], []>} : vector<8x128xf32>, vector<128x128xf32>, vector<8x128xf32> -> vector<8x128xf32>
      %119 = vector.extract_strided_slice %109 {offsets = [0, 0, 0], sizes = [1, 8, 128], strides = [1, 1, 1]} : vector<3x8x128xf32> to vector<1x8x128xf32>
      %120 = vector.shape_cast %119 : vector<1x8x128xf32> to vector<8x128xf32>
      %121 = arith.addf %120, %112 : vector<8x128xf32>
      %122 = arith.negf %121 : vector<8x128xf32>
      %123 = math.exp %122 : vector<8x128xf32>
      %cst_60 = arith.constant 1.000000e+00 : f32
      %124 = vector.broadcast %cst_60 : f32 to vector<8x128xf32>
      %125 = arith.addf %124, %123 : vector<8x128xf32>
      %126 = arith.divf %124, %125 : vector<8x128xf32>
      %127 = vector.extract_strided_slice %109 {offsets = [1, 0, 0], sizes = [1, 8, 128], strides = [1, 1, 1]} : vector<3x8x128xf32> to vector<1x8x128xf32>
      %128 = vector.shape_cast %127 : vector<1x8x128xf32> to vector<8x128xf32>
      %129 = arith.addf %128, %115 : vector<8x128xf32>
      %130 = arith.negf %129 : vector<8x128xf32>
      %131 = math.exp %130 : vector<8x128xf32>
      %cst_61 = arith.constant 1.000000e+00 : f32
      %132 = vector.broadcast %cst_61 : f32 to vector<8x128xf32>
      %133 = arith.addf %132, %131 : vector<8x128xf32>
      %134 = arith.divf %132, %133 : vector<8x128xf32>
      %135 = vector.extract_strided_slice %109 {offsets = [2, 0, 0], sizes = [1, 8, 128], strides = [1, 1, 1]} : vector<3x8x128xf32> to vector<1x8x128xf32>
      %136 = vector.shape_cast %135 : vector<1x8x128xf32> to vector<8x128xf32>
      %137 = vector.broadcast %12 : vector<1x128xf32> to vector<8x128xf32>
      %138 = arith.addf %118, %137 : vector<8x128xf32>
      %139 = arith.mulf %126, %138 : vector<8x128xf32>
      %140 = arith.addf %136, %139 : vector<8x128xf32>
      %141 = math.tanh %140 : vector<8x128xf32>
      %cst_62 = arith.constant 1.000000e+00 : f32
      %142 = vector.broadcast %cst_62 : f32 to vector<8x128xf32>
      %143 = arith.subf %142, %134 : vector<8x128xf32>
      %144 = arith.mulf %143, %141 : vector<8x128xf32>
      %145 = arith.mulf %134, %106 : vector<8x128xf32>
      %146 = arith.addf %144, %145 : vector<8x128xf32>
      %147 = arith.addi %13, %c2_i32 : i32
      %148 = vector.broadcast %147 : i32 to vector<8x1xi32>
      %149 = arith.cmpi sgt, %11, %148 : vector<8x1xi32>
      %150 = vector.shape_cast %149 : vector<8x1xi1> to vector<8x1xi1>
      %151 = vector.broadcast %150 : vector<8x1xi1> to vector<8x128xi1>
      %152 = arith.select %151, %146, %106 : vector<8x128xi1>, vector<8x128xf32>
      %c3_i32 = arith.constant 3 : i32
      %153 = arith.index_cast %c3_i32 : i32 to index
      %c0_63 = arith.constant 0 : index
      %c0_64 = arith.constant 0 : index
      %c0_65 = arith.constant 0 : index
      %154 = vector.load %arg3[%153, %c0_63, %c0_64, %c0_65] : memref<8x3x8x128xf32, #tpu.memory_space<vmem>>, vector<1x3x8x128xf32>
      %155 = vector.shape_cast %154 : vector<1x3x8x128xf32> to vector<3x8x128xf32>
      %c0_66 = arith.constant 0 : index
      %c0_67 = arith.constant 0 : index
      %c0_68 = arith.constant 0 : index
      %156 = vector.load %arg5[%c0_66, %c0_67, %c0_68] : memref<3x128x128xf32, #tpu.memory_space<vmem>>, vector<1x128x128xf32>
      %157 = vector.shape_cast %156 : vector<1x128x128xf32> to vector<128x128xf32>
      %cst_69 = arith.constant dense<0.000000e+00> : vector<8x128xf32>
      %158 = tpu.matmul %152, %157, %cst_69 {dimension_numbers = #tpu.dot_dimension_numbers<[1], [0], [0], [1], [0, 0, 1, 1], [], []>} : vector<8x128xf32>, vector<128x128xf32>, vector<8x128xf32> -> vector<8x128xf32>
      %c1_70 = arith.constant 1 : index
      %c0_71 = arith.constant 0 : index
      %c0_72 = arith.constant 0 : index
      %159 = vector.load %arg5[%c1_70, %c0_71, %c0_72] : memref<3x128x128xf32, #tpu.memory_space<vmem>>, vector<1x128x128xf32>
      %160 = vector.shape_cast %159 : vector<1x128x128xf32> to vector<128x128xf32>
      %cst_73 = arith.constant dense<0.000000e+00> : vector<8x128xf32>
      %161 = tpu.matmul %152, %160, %cst_73 {dimension_numbers = #tpu.dot_dimension_numbers<[1], [0], [0], [1], [0, 0, 1, 1], [], []>} : vector<8x128xf32>, vector<128x128xf32>, vector<8x128xf32> -> vector<8x128xf32>
      %c2_74 = arith.constant 2 : index
      %c0_75 = arith.constant 0 : index
      %c0_76 = arith.constant 0 : index
      %162 = vector.load %arg5[%c2_74, %c0_75, %c0_76] : memref<3x128x128xf32, #tpu.memory_space<vmem>>, vector<1x128x128xf32>
      %163 = vector.shape_cast %162 : vector<1x128x128xf32> to vector<128x128xf32>
      %cst_77 = arith.constant dense<0.000000e+00> : vector<8x128xf32>
      %164 = tpu.matmul %152, %163, %cst_77 {dimension_numbers = #tpu.dot_dimension_numbers<[1], [0], [0], [1], [0, 0, 1, 1], [], []>} : vector<8x128xf32>, vector<128x128xf32>, vector<8x128xf32> -> vector<8x128xf32>
      %165 = vector.extract_strided_slice %155 {offsets = [0, 0, 0], sizes = [1, 8, 128], strides = [1, 1, 1]} : vector<3x8x128xf32> to vector<1x8x128xf32>
      %166 = vector.shape_cast %165 : vector<1x8x128xf32> to vector<8x128xf32>
      %167 = arith.addf %166, %158 : vector<8x128xf32>
      %168 = arith.negf %167 : vector<8x128xf32>
      %169 = math.exp %168 : vector<8x128xf32>
      %cst_78 = arith.constant 1.000000e+00 : f32
      %170 = vector.broadcast %cst_78 : f32 to vector<8x128xf32>
      %171 = arith.addf %170, %169 : vector<8x128xf32>
      %172 = arith.divf %170, %171 : vector<8x128xf32>
      %173 = vector.extract_strided_slice %155 {offsets = [1, 0, 0], sizes = [1, 8, 128], strides = [1, 1, 1]} : vector<3x8x128xf32> to vector<1x8x128xf32>
      %174 = vector.shape_cast %173 : vector<1x8x128xf32> to vector<8x128xf32>
      %175 = arith.addf %174, %161 : vector<8x128xf32>
      %176 = arith.negf %175 : vector<8x128xf32>
      %177 = math.exp %176 : vector<8x128xf32>
      %cst_79 = arith.constant 1.000000e+00 : f32
      %178 = vector.broadcast %cst_79 : f32 to vector<8x128xf32>
      %179 = arith.addf %178, %177 : vector<8x128xf32>
      %180 = arith.divf %178, %179 : vector<8x128xf32>
      %181 = vector.extract_strided_slice %155 {offsets = [2, 0, 0], sizes = [1, 8, 128], strides = [1, 1, 1]} : vector<3x8x128xf32> to vector<1x8x128xf32>
      %182 = vector.shape_cast %181 : vector<1x8x128xf32> to vector<8x128xf32>
      %183 = vector.broadcast %12 : vector<1x128xf32> to vector<8x128xf32>
      %184 = arith.addf %164, %183 : vector<8x128xf32>
      %185 = arith.mulf %172, %184 : vector<8x128xf32>
      %186 = arith.addf %182, %185 : vector<8x128xf32>
      %187 = math.tanh %186 : vector<8x128xf32>
      %cst_80 = arith.constant 1.000000e+00 : f32
      %188 = vector.broadcast %cst_80 : f32 to vector<8x128xf32>
      %189 = arith.subf %188, %180 : vector<8x128xf32>
      %190 = arith.mulf %189, %187 : vector<8x128xf32>
      %191 = arith.mulf %180, %152 : vector<8x128xf32>
      %192 = arith.addf %190, %191 : vector<8x128xf32>
      %193 = arith.addi %13, %c3_i32 : i32
      %194 = vector.broadcast %193 : i32 to vector<8x1xi32>
      %195 = arith.cmpi sgt, %11, %194 : vector<8x1xi32>
      %196 = vector.shape_cast %195 : vector<8x1xi1> to vector<8x1xi1>
      %197 = vector.broadcast %196 : vector<8x1xi1> to vector<8x128xi1>
      %198 = arith.select %197, %192, %152 : vector<8x128xi1>, vector<8x128xf32>
      %c4_i32 = arith.constant 4 : i32
      %199 = arith.index_cast %c4_i32 : i32 to index
      %c0_81 = arith.constant 0 : index
      %c0_82 = arith.constant 0 : index
      %c0_83 = arith.constant 0 : index
      %200 = vector.load %arg3[%199, %c0_81, %c0_82, %c0_83] : memref<8x3x8x128xf32, #tpu.memory_space<vmem>>, vector<1x3x8x128xf32>
      %201 = vector.shape_cast %200 : vector<1x3x8x128xf32> to vector<3x8x128xf32>
      %c0_84 = arith.constant 0 : index
      %c0_85 = arith.constant 0 : index
      %c0_86 = arith.constant 0 : index
      %202 = vector.load %arg5[%c0_84, %c0_85, %c0_86] : memref<3x128x128xf32, #tpu.memory_space<vmem>>, vector<1x128x128xf32>
      %203 = vector.shape_cast %202 : vector<1x128x128xf32> to vector<128x128xf32>
      %cst_87 = arith.constant dense<0.000000e+00> : vector<8x128xf32>
      %204 = tpu.matmul %198, %203, %cst_87 {dimension_numbers = #tpu.dot_dimension_numbers<[1], [0], [0], [1], [0, 0, 1, 1], [], []>} : vector<8x128xf32>, vector<128x128xf32>, vector<8x128xf32> -> vector<8x128xf32>
      %c1_88 = arith.constant 1 : index
      %c0_89 = arith.constant 0 : index
      %c0_90 = arith.constant 0 : index
      %205 = vector.load %arg5[%c1_88, %c0_89, %c0_90] : memref<3x128x128xf32, #tpu.memory_space<vmem>>, vector<1x128x128xf32>
      %206 = vector.shape_cast %205 : vector<1x128x128xf32> to vector<128x128xf32>
      %cst_91 = arith.constant dense<0.000000e+00> : vector<8x128xf32>
      %207 = tpu.matmul %198, %206, %cst_91 {dimension_numbers = #tpu.dot_dimension_numbers<[1], [0], [0], [1], [0, 0, 1, 1], [], []>} : vector<8x128xf32>, vector<128x128xf32>, vector<8x128xf32> -> vector<8x128xf32>
      %c2_92 = arith.constant 2 : index
      %c0_93 = arith.constant 0 : index
      %c0_94 = arith.constant 0 : index
      %208 = vector.load %arg5[%c2_92, %c0_93, %c0_94] : memref<3x128x128xf32, #tpu.memory_space<vmem>>, vector<1x128x128xf32>
      %209 = vector.shape_cast %208 : vector<1x128x128xf32> to vector<128x128xf32>
      %cst_95 = arith.constant dense<0.000000e+00> : vector<8x128xf32>
      %210 = tpu.matmul %198, %209, %cst_95 {dimension_numbers = #tpu.dot_dimension_numbers<[1], [0], [0], [1], [0, 0, 1, 1], [], []>} : vector<8x128xf32>, vector<128x128xf32>, vector<8x128xf32> -> vector<8x128xf32>
      %211 = vector.extract_strided_slice %201 {offsets = [0, 0, 0], sizes = [1, 8, 128], strides = [1, 1, 1]} : vector<3x8x128xf32> to vector<1x8x128xf32>
      %212 = vector.shape_cast %211 : vector<1x8x128xf32> to vector<8x128xf32>
      %213 = arith.addf %212, %204 : vector<8x128xf32>
      %214 = arith.negf %213 : vector<8x128xf32>
      %215 = math.exp %214 : vector<8x128xf32>
      %cst_96 = arith.constant 1.000000e+00 : f32
      %216 = vector.broadcast %cst_96 : f32 to vector<8x128xf32>
      %217 = arith.addf %216, %215 : vector<8x128xf32>
      %218 = arith.divf %216, %217 : vector<8x128xf32>
      %219 = vector.extract_strided_slice %201 {offsets = [1, 0, 0], sizes = [1, 8, 128], strides = [1, 1, 1]} : vector<3x8x128xf32> to vector<1x8x128xf32>
      %220 = vector.shape_cast %219 : vector<1x8x128xf32> to vector<8x128xf32>
      %221 = arith.addf %220, %207 : vector<8x128xf32>
      %222 = arith.negf %221 : vector<8x128xf32>
      %223 = math.exp %222 : vector<8x128xf32>
      %cst_97 = arith.constant 1.000000e+00 : f32
      %224 = vector.broadcast %cst_97 : f32 to vector<8x128xf32>
      %225 = arith.addf %224, %223 : vector<8x128xf32>
      %226 = arith.divf %224, %225 : vector<8x128xf32>
      %227 = vector.extract_strided_slice %201 {offsets = [2, 0, 0], sizes = [1, 8, 128], strides = [1, 1, 1]} : vector<3x8x128xf32> to vector<1x8x128xf32>
      %228 = vector.shape_cast %227 : vector<1x8x128xf32> to vector<8x128xf32>
      %229 = vector.broadcast %12 : vector<1x128xf32> to vector<8x128xf32>
      %230 = arith.addf %210, %229 : vector<8x128xf32>
      %231 = arith.mulf %218, %230 : vector<8x128xf32>
      %232 = arith.addf %228, %231 : vector<8x128xf32>
      %233 = math.tanh %232 : vector<8x128xf32>
      %cst_98 = arith.constant 1.000000e+00 : f32
      %234 = vector.broadcast %cst_98 : f32 to vector<8x128xf32>
      %235 = arith.subf %234, %226 : vector<8x128xf32>
      %236 = arith.mulf %235, %233 : vector<8x128xf32>
      %237 = arith.mulf %226, %198 : vector<8x128xf32>
      %238 = arith.addf %236, %237 : vector<8x128xf32>
      %239 = arith.addi %13, %c4_i32 : i32
      %240 = vector.broadcast %239 : i32 to vector<8x1xi32>
      %241 = arith.cmpi sgt, %11, %240 : vector<8x1xi32>
      %242 = vector.shape_cast %241 : vector<8x1xi1> to vector<8x1xi1>
      %243 = vector.broadcast %242 : vector<8x1xi1> to vector<8x128xi1>
      %244 = arith.select %243, %238, %198 : vector<8x128xi1>, vector<8x128xf32>
      %c5_i32 = arith.constant 5 : i32
      %245 = arith.index_cast %c5_i32 : i32 to index
      %c0_99 = arith.constant 0 : index
      %c0_100 = arith.constant 0 : index
      %c0_101 = arith.constant 0 : index
      %246 = vector.load %arg3[%245, %c0_99, %c0_100, %c0_101] : memref<8x3x8x128xf32, #tpu.memory_space<vmem>>, vector<1x3x8x128xf32>
      %247 = vector.shape_cast %246 : vector<1x3x8x128xf32> to vector<3x8x128xf32>
      %c0_102 = arith.constant 0 : index
      %c0_103 = arith.constant 0 : index
      %c0_104 = arith.constant 0 : index
      %248 = vector.load %arg5[%c0_102, %c0_103, %c0_104] : memref<3x128x128xf32, #tpu.memory_space<vmem>>, vector<1x128x128xf32>
      %249 = vector.shape_cast %248 : vector<1x128x128xf32> to vector<128x128xf32>
      %cst_105 = arith.constant dense<0.000000e+00> : vector<8x128xf32>
      %250 = tpu.matmul %244, %249, %cst_105 {dimension_numbers = #tpu.dot_dimension_numbers<[1], [0], [0], [1], [0, 0, 1, 1], [], []>} : vector<8x128xf32>, vector<128x128xf32>, vector<8x128xf32> -> vector<8x128xf32>
      %c1_106 = arith.constant 1 : index
      %c0_107 = arith.constant 0 : index
      %c0_108 = arith.constant 0 : index
      %251 = vector.load %arg5[%c1_106, %c0_107, %c0_108] : memref<3x128x128xf32, #tpu.memory_space<vmem>>, vector<1x128x128xf32>
      %252 = vector.shape_cast %251 : vector<1x128x128xf32> to vector<128x128xf32>
      %cst_109 = arith.constant dense<0.000000e+00> : vector<8x128xf32>
      %253 = tpu.matmul %244, %252, %cst_109 {dimension_numbers = #tpu.dot_dimension_numbers<[1], [0], [0], [1], [0, 0, 1, 1], [], []>} : vector<8x128xf32>, vector<128x128xf32>, vector<8x128xf32> -> vector<8x128xf32>
      %c2_110 = arith.constant 2 : index
      %c0_111 = arith.constant 0 : index
      %c0_112 = arith.constant 0 : index
      %254 = vector.load %arg5[%c2_110, %c0_111, %c0_112] : memref<3x128x128xf32, #tpu.memory_space<vmem>>, vector<1x128x128xf32>
      %255 = vector.shape_cast %254 : vector<1x128x128xf32> to vector<128x128xf32>
      %cst_113 = arith.constant dense<0.000000e+00> : vector<8x128xf32>
      %256 = tpu.matmul %244, %255, %cst_113 {dimension_numbers = #tpu.dot_dimension_numbers<[1], [0], [0], [1], [0, 0, 1, 1], [], []>} : vector<8x128xf32>, vector<128x128xf32>, vector<8x128xf32> -> vector<8x128xf32>
      %257 = vector.extract_strided_slice %247 {offsets = [0, 0, 0], sizes = [1, 8, 128], strides = [1, 1, 1]} : vector<3x8x128xf32> to vector<1x8x128xf32>
      %258 = vector.shape_cast %257 : vector<1x8x128xf32> to vector<8x128xf32>
      %259 = arith.addf %258, %250 : vector<8x128xf32>
      %260 = arith.negf %259 : vector<8x128xf32>
      %261 = math.exp %260 : vector<8x128xf32>
      %cst_114 = arith.constant 1.000000e+00 : f32
      %262 = vector.broadcast %cst_114 : f32 to vector<8x128xf32>
      %263 = arith.addf %262, %261 : vector<8x128xf32>
      %264 = arith.divf %262, %263 : vector<8x128xf32>
      %265 = vector.extract_strided_slice %247 {offsets = [1, 0, 0], sizes = [1, 8, 128], strides = [1, 1, 1]} : vector<3x8x128xf32> to vector<1x8x128xf32>
      %266 = vector.shape_cast %265 : vector<1x8x128xf32> to vector<8x128xf32>
      %267 = arith.addf %266, %253 : vector<8x128xf32>
      %268 = arith.negf %267 : vector<8x128xf32>
      %269 = math.exp %268 : vector<8x128xf32>
      %cst_115 = arith.constant 1.000000e+00 : f32
      %270 = vector.broadcast %cst_115 : f32 to vector<8x128xf32>
      %271 = arith.addf %270, %269 : vector<8x128xf32>
      %272 = arith.divf %270, %271 : vector<8x128xf32>
      %273 = vector.extract_strided_slice %247 {offsets = [2, 0, 0], sizes = [1, 8, 128], strides = [1, 1, 1]} : vector<3x8x128xf32> to vector<1x8x128xf32>
      %274 = vector.shape_cast %273 : vector<1x8x128xf32> to vector<8x128xf32>
      %275 = vector.broadcast %12 : vector<1x128xf32> to vector<8x128xf32>
      %276 = arith.addf %256, %275 : vector<8x128xf32>
      %277 = arith.mulf %264, %276 : vector<8x128xf32>
      %278 = arith.addf %274, %277 : vector<8x128xf32>
      %279 = math.tanh %278 : vector<8x128xf32>
      %cst_116 = arith.constant 1.000000e+00 : f32
      %280 = vector.broadcast %cst_116 : f32 to vector<8x128xf32>
      %281 = arith.subf %280, %272 : vector<8x128xf32>
      %282 = arith.mulf %281, %279 : vector<8x128xf32>
      %283 = arith.mulf %272, %244 : vector<8x128xf32>
      %284 = arith.addf %282, %283 : vector<8x128xf32>
      %285 = arith.addi %13, %c5_i32 : i32
      %286 = vector.broadcast %285 : i32 to vector<8x1xi32>
      %287 = arith.cmpi sgt, %11, %286 : vector<8x1xi32>
      %288 = vector.shape_cast %287 : vector<8x1xi1> to vector<8x1xi1>
      %289 = vector.broadcast %288 : vector<8x1xi1> to vector<8x128xi1>
      %290 = arith.select %289, %284, %244 : vector<8x128xi1>, vector<8x128xf32>
      %c6_i32 = arith.constant 6 : i32
      %291 = arith.index_cast %c6_i32 : i32 to index
      %c0_117 = arith.constant 0 : index
      %c0_118 = arith.constant 0 : index
      %c0_119 = arith.constant 0 : index
      %292 = vector.load %arg3[%291, %c0_117, %c0_118, %c0_119] : memref<8x3x8x128xf32, #tpu.memory_space<vmem>>, vector<1x3x8x128xf32>
      %293 = vector.shape_cast %292 : vector<1x3x8x128xf32> to vector<3x8x128xf32>
      %c0_120 = arith.constant 0 : index
      %c0_121 = arith.constant 0 : index
      %c0_122 = arith.constant 0 : index
      %294 = vector.load %arg5[%c0_120, %c0_121, %c0_122] : memref<3x128x128xf32, #tpu.memory_space<vmem>>, vector<1x128x128xf32>
      %295 = vector.shape_cast %294 : vector<1x128x128xf32> to vector<128x128xf32>
      %cst_123 = arith.constant dense<0.000000e+00> : vector<8x128xf32>
      %296 = tpu.matmul %290, %295, %cst_123 {dimension_numbers = #tpu.dot_dimension_numbers<[1], [0], [0], [1], [0, 0, 1, 1], [], []>} : vector<8x128xf32>, vector<128x128xf32>, vector<8x128xf32> -> vector<8x128xf32>
      %c1_124 = arith.constant 1 : index
      %c0_125 = arith.constant 0 : index
      %c0_126 = arith.constant 0 : index
      %297 = vector.load %arg5[%c1_124, %c0_125, %c0_126] : memref<3x128x128xf32, #tpu.memory_space<vmem>>, vector<1x128x128xf32>
      %298 = vector.shape_cast %297 : vector<1x128x128xf32> to vector<128x128xf32>
      %cst_127 = arith.constant dense<0.000000e+00> : vector<8x128xf32>
      %299 = tpu.matmul %290, %298, %cst_127 {dimension_numbers = #tpu.dot_dimension_numbers<[1], [0], [0], [1], [0, 0, 1, 1], [], []>} : vector<8x128xf32>, vector<128x128xf32>, vector<8x128xf32> -> vector<8x128xf32>
      %c2_128 = arith.constant 2 : index
      %c0_129 = arith.constant 0 : index
      %c0_130 = arith.constant 0 : index
      %300 = vector.load %arg5[%c2_128, %c0_129, %c0_130] : memref<3x128x128xf32, #tpu.memory_space<vmem>>, vector<1x128x128xf32>
      %301 = vector.shape_cast %300 : vector<1x128x128xf32> to vector<128x128xf32>
      %cst_131 = arith.constant dense<0.000000e+00> : vector<8x128xf32>
      %302 = tpu.matmul %290, %301, %cst_131 {dimension_numbers = #tpu.dot_dimension_numbers<[1], [0], [0], [1], [0, 0, 1, 1], [], []>} : vector<8x128xf32>, vector<128x128xf32>, vector<8x128xf32> -> vector<8x128xf32>
      %303 = vector.extract_strided_slice %293 {offsets = [0, 0, 0], sizes = [1, 8, 128], strides = [1, 1, 1]} : vector<3x8x128xf32> to vector<1x8x128xf32>
      %304 = vector.shape_cast %303 : vector<1x8x128xf32> to vector<8x128xf32>
      %305 = arith.addf %304, %296 : vector<8x128xf32>
      %306 = arith.negf %305 : vector<8x128xf32>
      %307 = math.exp %306 : vector<8x128xf32>
      %cst_132 = arith.constant 1.000000e+00 : f32
      %308 = vector.broadcast %cst_132 : f32 to vector<8x128xf32>
      %309 = arith.addf %308, %307 : vector<8x128xf32>
      %310 = arith.divf %308, %309 : vector<8x128xf32>
      %311 = vector.extract_strided_slice %293 {offsets = [1, 0, 0], sizes = [1, 8, 128], strides = [1, 1, 1]} : vector<3x8x128xf32> to vector<1x8x128xf32>
      %312 = vector.shape_cast %311 : vector<1x8x128xf32> to vector<8x128xf32>
      %313 = arith.addf %312, %299 : vector<8x128xf32>
      %314 = arith.negf %313 : vector<8x128xf32>
      %315 = math.exp %314 : vector<8x128xf32>
      %cst_133 = arith.constant 1.000000e+00 : f32
      %316 = vector.broadcast %cst_133 : f32 to vector<8x128xf32>
      %317 = arith.addf %316, %315 : vector<8x128xf32>
      %318 = arith.divf %316, %317 : vector<8x128xf32>
      %319 = vector.extract_strided_slice %293 {offsets = [2, 0, 0], sizes = [1, 8, 128], strides = [1, 1, 1]} : vector<3x8x128xf32> to vector<1x8x128xf32>
      %320 = vector.shape_cast %319 : vector<1x8x128xf32> to vector<8x128xf32>
      %321 = vector.broadcast %12 : vector<1x128xf32> to vector<8x128xf32>
      %322 = arith.addf %302, %321 : vector<8x128xf32>
      %323 = arith.mulf %310, %322 : vector<8x128xf32>
      %324 = arith.addf %320, %323 : vector<8x128xf32>
      %325 = math.tanh %324 : vector<8x128xf32>
      %cst_134 = arith.constant 1.000000e+00 : f32
      %326 = vector.broadcast %cst_134 : f32 to vector<8x128xf32>
      %327 = arith.subf %326, %318 : vector<8x128xf32>
      %328 = arith.mulf %327, %325 : vector<8x128xf32>
      %329 = arith.mulf %318, %290 : vector<8x128xf32>
      %330 = arith.addf %328, %329 : vector<8x128xf32>
      %331 = arith.addi %13, %c6_i32 : i32
      %332 = vector.broadcast %331 : i32 to vector<8x1xi32>
      %333 = arith.cmpi sgt, %11, %332 : vector<8x1xi32>
      %334 = vector.shape_cast %333 : vector<8x1xi1> to vector<8x1xi1>
      %335 = vector.broadcast %334 : vector<8x1xi1> to vector<8x128xi1>
      %336 = arith.select %335, %330, %290 : vector<8x128xi1>, vector<8x128xf32>
      %c7_i32 = arith.constant 7 : i32
      %337 = arith.index_cast %c7_i32 : i32 to index
      %c0_135 = arith.constant 0 : index
      %c0_136 = arith.constant 0 : index
      %c0_137 = arith.constant 0 : index
      %338 = vector.load %arg3[%337, %c0_135, %c0_136, %c0_137] : memref<8x3x8x128xf32, #tpu.memory_space<vmem>>, vector<1x3x8x128xf32>
      %339 = vector.shape_cast %338 : vector<1x3x8x128xf32> to vector<3x8x128xf32>
      %c0_138 = arith.constant 0 : index
      %c0_139 = arith.constant 0 : index
      %c0_140 = arith.constant 0 : index
      %340 = vector.load %arg5[%c0_138, %c0_139, %c0_140] : memref<3x128x128xf32, #tpu.memory_space<vmem>>, vector<1x128x128xf32>
      %341 = vector.shape_cast %340 : vector<1x128x128xf32> to vector<128x128xf32>
      %cst_141 = arith.constant dense<0.000000e+00> : vector<8x128xf32>
      %342 = tpu.matmul %336, %341, %cst_141 {dimension_numbers = #tpu.dot_dimension_numbers<[1], [0], [0], [1], [0, 0, 1, 1], [], []>} : vector<8x128xf32>, vector<128x128xf32>, vector<8x128xf32> -> vector<8x128xf32>
      %c1_142 = arith.constant 1 : index
      %c0_143 = arith.constant 0 : index
      %c0_144 = arith.constant 0 : index
      %343 = vector.load %arg5[%c1_142, %c0_143, %c0_144] : memref<3x128x128xf32, #tpu.memory_space<vmem>>, vector<1x128x128xf32>
      %344 = vector.shape_cast %343 : vector<1x128x128xf32> to vector<128x128xf32>
      %cst_145 = arith.constant dense<0.000000e+00> : vector<8x128xf32>
      %345 = tpu.matmul %336, %344, %cst_145 {dimension_numbers = #tpu.dot_dimension_numbers<[1], [0], [0], [1], [0, 0, 1, 1], [], []>} : vector<8x128xf32>, vector<128x128xf32>, vector<8x128xf32> -> vector<8x128xf32>
      %c2_146 = arith.constant 2 : index
      %c0_147 = arith.constant 0 : index
      %c0_148 = arith.constant 0 : index
      %346 = vector.load %arg5[%c2_146, %c0_147, %c0_148] : memref<3x128x128xf32, #tpu.memory_space<vmem>>, vector<1x128x128xf32>
      %347 = vector.shape_cast %346 : vector<1x128x128xf32> to vector<128x128xf32>
      %cst_149 = arith.constant dense<0.000000e+00> : vector<8x128xf32>
      %348 = tpu.matmul %336, %347, %cst_149 {dimension_numbers = #tpu.dot_dimension_numbers<[1], [0], [0], [1], [0, 0, 1, 1], [], []>} : vector<8x128xf32>, vector<128x128xf32>, vector<8x128xf32> -> vector<8x128xf32>
      %349 = vector.extract_strided_slice %339 {offsets = [0, 0, 0], sizes = [1, 8, 128], strides = [1, 1, 1]} : vector<3x8x128xf32> to vector<1x8x128xf32>
      %350 = vector.shape_cast %349 : vector<1x8x128xf32> to vector<8x128xf32>
      %351 = arith.addf %350, %342 : vector<8x128xf32>
      %352 = arith.negf %351 : vector<8x128xf32>
      %353 = math.exp %352 : vector<8x128xf32>
      %cst_150 = arith.constant 1.000000e+00 : f32
      %354 = vector.broadcast %cst_150 : f32 to vector<8x128xf32>
      %355 = arith.addf %354, %353 : vector<8x128xf32>
      %356 = arith.divf %354, %355 : vector<8x128xf32>
      %357 = vector.extract_strided_slice %339 {offsets = [1, 0, 0], sizes = [1, 8, 128], strides = [1, 1, 1]} : vector<3x8x128xf32> to vector<1x8x128xf32>
      %358 = vector.shape_cast %357 : vector<1x8x128xf32> to vector<8x128xf32>
      %359 = arith.addf %358, %345 : vector<8x128xf32>
      %360 = arith.negf %359 : vector<8x128xf32>
      %361 = math.exp %360 : vector<8x128xf32>
      %cst_151 = arith.constant 1.000000e+00 : f32
      %362 = vector.broadcast %cst_151 : f32 to vector<8x128xf32>
      %363 = arith.addf %362, %361 : vector<8x128xf32>
      %364 = arith.divf %362, %363 : vector<8x128xf32>
      %365 = vector.extract_strided_slice %339 {offsets = [2, 0, 0], sizes = [1, 8, 128], strides = [1, 1, 1]} : vector<3x8x128xf32> to vector<1x8x128xf32>
      %366 = vector.shape_cast %365 : vector<1x8x128xf32> to vector<8x128xf32>
      %367 = vector.broadcast %12 : vector<1x128xf32> to vector<8x128xf32>
      %368 = arith.addf %348, %367 : vector<8x128xf32>
      %369 = arith.mulf %356, %368 : vector<8x128xf32>
      %370 = arith.addf %366, %369 : vector<8x128xf32>
      %371 = math.tanh %370 : vector<8x128xf32>
      %cst_152 = arith.constant 1.000000e+00 : f32
      %372 = vector.broadcast %cst_152 : f32 to vector<8x128xf32>
      %373 = arith.subf %372, %364 : vector<8x128xf32>
      %374 = arith.mulf %373, %371 : vector<8x128xf32>
      %375 = arith.mulf %364, %336 : vector<8x128xf32>
      %376 = arith.addf %374, %375 : vector<8x128xf32>
      %377 = arith.addi %13, %c7_i32 : i32
      %378 = vector.broadcast %377 : i32 to vector<8x1xi32>
      %379 = arith.cmpi sgt, %11, %378 : vector<8x1xi32>
      %380 = vector.shape_cast %379 : vector<8x1xi1> to vector<8x1xi1>
      %381 = vector.broadcast %380 : vector<8x1xi1> to vector<8x128xi1>
      %382 = arith.select %381, %376, %336 : vector<8x128xi1>, vector<8x128xf32>
      %c8_i32_153 = arith.constant 8 : i32
      %c0_154 = arith.constant 0 : index
      %c0_155 = arith.constant 0 : index
      %383 = vector.load %arg8[%c0_154, %c0_155] : memref<8x128xf32, #tpu.memory_space<vmem>>, vector<8x128xf32>
      tpu.vector_store %arg8[%c0_154, %c0_155], %382 {strides = array<i32>} : memref<8x128xf32, #tpu.memory_space<vmem>>, vector<8x128xf32>,
    } else {
    }
    %c0_i32_2 = arith.constant 0 : i32
    %8 = arith.cmpi eq, %arg1, %c0_i32_2 : i32
    %9 = arith.extui %8 : i1 to i32
    %c0_i32_3 = arith.constant 0 : i32
    %10 = arith.cmpi ne, %9, %c0_i32_3 : i32
    scf.if %10 {
      %c0_4 = arith.constant 0 : index
      %c0_5 = arith.constant 0 : index
      %11 = vector.load %arg8[%c0_4, %c0_5] : memref<8x128xf32, #tpu.memory_space<vmem>>, vector<8x128xf32>
      %c0_6 = arith.constant 0 : index
      %c0_7 = arith.constant 0 : index
      %12 = vector.load %arg7[%c0_6, %c0_7] : memref<8x128xf32, #tpu.memory_space<vmem>>, vector<8x128xf32>
      tpu.vector_store %arg7[%c0_6, %c0_7], %11 {strides = array<i32>} : memref<8x128xf32, #tpu.memory_space<vmem>>, vector<8x128xf32>,
    } else {
    }
    return
  }
  func.func @transform_0(%arg0: i32, %arg1: i32, %arg2: memref<1xi32, #tpu.memory_space<smem>>) -> (i32, i32, i32, i32) {
    %c0_i32 = arith.constant 0 : i32
    %c0_i32_0 = arith.constant 0 : i32
    %c0_i32_1 = arith.constant 0 : i32
    return %arg1, %c0_i32, %arg0, %c0_i32_0 : i32, i32, i32, i32
  }
  func.func @transform_1(%arg0: i32, %arg1: i32, %arg2: memref<1xi32, #tpu.memory_space<smem>>) -> (i32, i32) {
    %c0_i32 = arith.constant 0 : i32
    %c0_i32_0 = arith.constant 0 : i32
    return %arg0, %c0_i32 : i32, i32
  }
  func.func @transform_2(%arg0: i32, %arg1: i32, %arg2: memref<1xi32, #tpu.memory_space<smem>>) -> (i32, i32, i32) {
    %c0_i32 = arith.constant 0 : i32
    %c0_i32_0 = arith.constant 0 : i32
    %c0_i32_1 = arith.constant 0 : i32
    %c0_i32_2 = arith.constant 0 : i32
    return %c0_i32, %c0_i32_0, %c0_i32_1 : i32, i32, i32
  }
  func.func @transform_3(%arg0: i32, %arg1: i32, %arg2: memref<1xi32, #tpu.memory_space<smem>>) -> (i32, i32) {
    %c0_i32 = arith.constant 0 : i32
    %c0_i32_0 = arith.constant 0 : i32
    %c0_i32_1 = arith.constant 0 : i32
    return %c0_i32, %c0_i32_0 : i32, i32
  }
  func.func @transform_4(%arg0: i32, %arg1: i32, %arg2: memref<1xi32, #tpu.memory_space<smem>>) -> (i32, i32) {
    %c0_i32 = arith.constant 0 : i32
    %c0_i32_0 = arith.constant 0 : i32
    return %arg0, %c0_i32 : i32, i32
  }
}

</mosaic_0001>

<bundles_post_ra>
// kernel: tpu_custom_call.1
= control target key start
LH: loop header
LB: loop body
LE: loop exit
PB: predicated region body
PF: predicated region fallthrough
CT: control target
= control target key end

     0   :  { %11 = vsyncpa [#allocation6], 0  ;;  %s4743_s0 = inlined_call_operand.<no memory space> [shape: s32[1], index: 0, kind: input, shape index: {}]   ;;  %s4744_s1 = inlined_call_operand.hbm [shape: f32[8,3,8,128], index: 1, kind: input, shape index: {}]   ;;  %s4745_s2 = inlined_call_operand.vmem [shape: s32[8,1], index: 2, kind: input, shape index: {}]   ;;  %s4746_s3 = inlined_call_operand.hbm [shape: f32[3,128,128], index: 3, kind: input, shape index: {}]   ;;  %s4747_s4 = inlined_call_operand.vmem [shape: f32[1,128], index: 4, kind: input, shape index: {}]   ;;  %s4748_s5 = inlined_call_operand.hbm [shape: f32[8,128], index: 5, kind: output, shape index: {}]  }
   0x1   :  { %12 = vsyncpa [#allocation9], 0 }
   0x2   :  { %13 = vsyncpa [#allocation7], 0  ;;  %s4098_s18 = smov [#allocation5]   ;;  %s4026_s22 = scalar_lea.hbm %s4744_s1, 3072 }
   0x3   :  { %s19_s19 = sshll.u32 %s4098_s18, 4  ;;  %p4027_p0 = scmp.ne.s32.totalorder %s4744_s1, %s4026_s22  ;;  %s20_s19 = int_to_ptr.vmem [resolvable:$true] %s19_s19 }
   0x4   :  { %p4030_p1 = scmp.lt.u32.totalorder %s4026_s22, %s4744_s1 }
   0x6   :  { %p4032_p2 = pnand %p4030_p1, %p4027_p0 }
   0x8   :  { %4035 = shalt.err (!%p4032_p2)
}
   0x9   :  { %s4036_s27 = scalar_lea.vmem %s20_s19, 3072  ;;  %p4041_p4 = scmp.lt.s32.totalorder %s20_s19, %s20_s19 }
   0xa   :  { %p4037_p3 = scmp.ne.s32.totalorder %s20_s19, %s4036_s27  ;;  %p4042_p5 = scmp.lt.s32.totalorder %s4036_s27, %s4036_s27 }
   0xc   :  { %p4043_p6 = por %p4042_p5, %p4041_p4 }
   0xe   :  { %p4044_p7 = pnand %p4043_p6, %p4037_p3 }
  0x10   :  { %4047 = shalt.err (!%p4044_p7)
}
  0x11   :  { %s4099_s28 = smov 128   ;;  %s4100_s29 = smov 8  }
  0x12   :  { %25 = dma.hbm_to_vmem [thread:$0]  %s4744_s1, 3072, %s20_s19, [#allocation6], %s4099_s28, %s4099_s28, %s4100_s29  }
  0x13   :  { %s4101_s7 = smov [#allocation8]   ;;  %s4048_s11 = scalar_lea.hbm %s4746_s3, 6144 }
  0x14   :  { %s33_s8 = sshll.u32 %s4101_s7, 4  ;;  %p4049_p8 = scmp.ne.s32.totalorder %s4746_s3, %s4048_s11  ;;  %s34_s8 = int_to_ptr.vmem [resolvable:$true] %s33_s8 }
  0x15   :  { %p4052_p9 = scmp.lt.u32.totalorder %s4048_s11, %s4746_s3 }
  0x17   :  { %p4054_p10 = pnand %p4052_p9, %p4049_p8 }
  0x19   :  { %4057 = shalt.err (!%p4054_p10)
}
  0x1a   :  { %s4058_s16 = scalar_lea.vmem %s34_s8, 6144  ;;  %p4063_p12 = scmp.lt.s32.totalorder %s34_s8, %s34_s8 }
  0x1b   :  { %p4059_p11 = scmp.ne.s32.totalorder %s34_s8, %s4058_s16  ;;  %p4064_p13 = scmp.lt.s32.totalorder %s4058_s16, %s4058_s16 }
  0x1d   :  { %p4065_p0 = por %p4064_p13, %p4063_p12 }
  0x1f   :  { %p4066_p1 = pnand %p4065_p0, %p4059_p11 }
  0x21   :  { %4069 = shalt.err (!%p4066_p1)
}
  0x22   :  { %39 = dma.hbm_to_vmem [thread:$0]  %s4746_s3, 6144, %s34_s8, [#allocation9], %s4099_s28, %s4099_s28, %s4100_s29  }
  0x23   :  { %4092 = dma.done.wait [#allocation6], 3072  }
  0x24   :  { %4093 = vsyncadd [#allocation6], 4294964224 }
  0x25   :  { %4094 = dma.done.wait [#allocation9], 6144  }
  0x26   :  { %4095 = vsyncadd [#allocation9], 4294961152  ;;  %v4102_v0 = vmov 0.0   ;;  %p2091_p2 = scmp.le.s32.totalorder %s4743_s0, 0 }
  0x27   :  { %52 = vst [vmem:[#allocation2] sm:$0xff] %v4102_v0  ;;  %v65_v1 = vld [vmem:[#allocation8] sm:$0xff] (!%p2091_p2)  ;;  %v66_v2 = vld [vmem:[#allocation8 + $0x8] sm:$0xff] (!%p2091_p2)  ;;  %v67_v3 = vld [vmem:[#allocation8 + $0x10] sm:$0xff] (!%p2091_p2)  ;;  %v4103_v4 = vmov (!%p2091_p2), 0.0|0.0   ;;  %vm4104_vm0 = vmmov (!%p2091_p2), 0  }
  0x28   :  { %58 = sbr.rel (%p2091_p2) target bundleno = 2202 (0x89a), region = 33  ;;  %3357 = vmatprep.subr.bf16.mxu0 (!%p2091_p2), %v4103_v4  ;;  %v4166_v5 = vpack.c.bf16 (!%p2091_p2), %v66_v2, %v65_v1  ;;  %v68_v6 = vld [vmem:[#allocation8 + $0x18] sm:$0xff] (!%p2091_p2)  ;;  %3381 = vmatprep.subr.bf16.mxu1 (!%p2091_p2), %v4103_v4  ;;  %v4105_v7 = vmov (!%p2091_p2), 0.0   ;;  %v152_v9 = vld [vmem:[#allocation8 + $0x80] sm:$0xff] (!%p2091_p2)  ;;  %v153_v10 = vld [vmem:[#allocation8 + $0x88] sm:$0xff] (!%p2091_p2)  ;;  %v4106_v11 = vmov (!%p2091_p2), 0  }
  0x29   :  { %2549 = vmatprep.mubr.msk.f32.mxu0 (!%p2091_p2), %vm4104_vm0, %v4105_v7  ;;  %2584 = vmatprep.mubr.msk.f32.mxu1 (!%p2091_p2), %vm4104_vm0, %v4105_v7  ;;  %v4174_v8 = vpack.c.bf16 (!%p2091_p2), %v68_v6, %v67_v3  ;;  %v69_v12 = vld [vmem:[#allocation8 + $0x20] sm:$0xff] (!%p2091_p2)  ;;  %v70_v13 = vld [vmem:[#allocation8 + $0x28] sm:$0xff] (!%p2091_p2)  ;;  %v4178_v14 = vpack.c.bf16 (!%p2091_p2), %v153_v10, %v152_v9  ;;  %v154_v15 = vld [vmem:[#allocation8 + $0x90] sm:$0xff] (!%p2091_p2) }
  0x2a   :  { %3359 = vmatpush3.bf16.msra.mxu0 (!%p2091_p2), %v4166_v5  ;;  %3943 = vset.pattern.permute.xlu0 (!%p2091_p2), %v4106_v11  ;;  %v155_v16 = vld [vmem:[#allocation8 + $0x98] sm:$0xff] (!%p2091_p2)  ;;  %v4185_v18 = vpack.c.bf16 (!%p2091_p2), %v70_v13, %v69_v12  ;;  %v156_v19 = vld [vmem:[#allocation8 + $0xa0] sm:$0xff] (!%p2091_p2)  ;;  %v157_v20 = vld [vmem:[#allocation8 + $0xa8] sm:$0xff] (!%p2091_p2) }
  0x2b   :  { %3360 = vmatprep.subr.bf16.mxu0 (!%p2091_p2), %v4103_v4  ;;  %3944 = vset.pattern.permute.xlu1 (!%p2091_p2), %v4106_v11  ;;  %v4182_v17 = vpack.c.bf16 (!%p2091_p2), %v155_v16, %v154_v15  ;;  %v71_v21 = vld [vmem:[#allocation8 + $0x30] sm:$0xff] (!%p2091_p2)  ;;  %v72_v22 = vld [vmem:[#allocation8 + $0x38] sm:$0xff] (!%p2091_p2)  ;;  %v4190_v23 = vpack.c.bf16 (!%p2091_p2), %v157_v20, %v156_v19  ;;  %v73_v27 = vld [vmem:[#allocation8 + $0x40] sm:$0xff] (!%p2091_p2) }
  0x2c   :  { %3383 = vmatpush3.bf16.msra.mxu1 (!%p2091_p2), %v4178_v14  ;;  %v4193_v24 = vpack.c.bf16 (!%p2091_p2), %v72_v22, %v71_v21  ;;  %v158_v25 = vld [vmem:[#allocation8 + $0xb0] sm:$0xff] (!%p2091_p2)  ;;  %v159_v26 = vld [vmem:[#allocation8 + $0xb8] sm:$0xff] (!%p2091_p2)  ;;  %v74_v28 = vld [vmem:[#allocation8 + $0x48] sm:$0xff] (!%p2091_p2) }
  0x2d   :  { %3384 = vmatprep.subr.bf16.mxu1 (!%p2091_p2), %v4103_v4  ;;  %v4198_v29 = vpack.c.bf16 (!%p2091_p2), %v159_v26, %v158_v25  ;;  %v4201_v30 = vpack.c.bf16 (!%p2091_p2), %v74_v28, %v73_v27  ;;  %v160_v31 = vld [vmem:[#allocation8 + $0xc0] sm:$0xff] (!%p2091_p2)  ;;  %v161_v32 = vld [vmem:[#allocation8 + $0xc8] sm:$0xff] (!%p2091_p2)  ;;  %v75_v33 = vld [vmem:[#allocation8 + $0x50] sm:$0xff] (!%p2091_p2) }
  0x2e   :  { %3362 = vmatpush3.bf16.msra.mxu0 (!%p2091_p2), %v4174_v8  ;;  %v76_v34 = vld [vmem:[#allocation8 + $0x58] sm:$0xff] (!%p2091_p2)  ;;  %v4212_v36 = vpack.c.bf16 (!%p2091_p2), %v161_v32, %v160_v31  ;;  %v162_v39 = vld [vmem:[#allocation8 + $0xd0] sm:$0xff] (!%p2091_p2)  ;;  %v77_v41 = vld [vmem:[#allocation8 + $0x60] sm:$0xff] (!%p2091_p2) }
  0x2f   :  { %3363 = vmatprep.subr.bf16.mxu0 %v4103_v4  ;;  %v4208_v35 = vld [vmem:[%s4745_s2] sm:$0xff]  ;;  %v4217_v38 = vpack.c.bf16 %v76_v34, %v75_v33  ;;  %v78_v42 = vld [vmem:[#allocation8 + $0x68] sm:$0xff]  ;;  %v164_v46 = vld [vmem:[#allocation8 + $0xe0] sm:$0xff] }
  0x30   :  { %3386 = vmatpush3.bf16.msra.mxu1 %v4182_v17  ;;  %vm353_vm1 = vcmp.gt.s32.totalorder %v4208_v35, 0  ;;  %vm597_vm2 = vcmp.gt.s32.totalorder %v4208_v35, 1  ;;  %v163_v40 = vld [vmem:[#allocation8 + $0xd8] sm:$0xff]  ;;  %vm1329_vm3 = vcmp.gt.s32.totalorder %v4208_v35, 4  ;;  %v4227_v45 = vpack.c.bf16 %v78_v42, %v77_v41  ;;  %v165_v47 = vld [vmem:[#allocation8 + $0xe8] sm:$0xff]  ;;  %v79_v48 = vld [vmem:[#allocation8 + $0x70] sm:$0xff] }
  0x31   :  { %3387 = vmatprep.subr.bf16.mxu1 %v4103_v4  ;;  %v354_v37 = vsel %vm353_vm1, 1, %v4106_v11  ;;  %v598_v43 = vsel %vm597_vm2, 1, %v4106_v11  ;;  %v4223_v44 = vpack.c.bf16 %v163_v40, %v162_v39  ;;  %v80_v49 = vld [vmem:[#allocation8 + $0x78] sm:$0xff]  ;;  %v1330_v50 = vsel %vm1329_vm3, 1, %v4106_v11  ;;  %v166_v53 = vld [vmem:[#allocation8 + $0xf0] sm:$0xff]  ;;  %v239_v55 = vld [vmem:[#allocation8 + $0x100] sm:$0xff] }
  0x32   :  { %3365 = vmatpush3.bf16.msra.mxu0 %v4185_v18  ;;  %356 = vperm.xlu0 %3943, %v354_v37   ;;  %v4233_v51 = vpack.c.bf16 %v165_v47, %v164_v46  ;;  %vm1817_vm4 = vcmp.gt.s32.totalorder %v4208_v35, 6  ;;  %v4237_v52 = vpack.c.bf16 %v80_v49, %v79_v48  ;;  %v167_v54 = vld [vmem:[#allocation8 + $0xf8] sm:$0xff]  ;;  %v240_v56 = vld [vmem:[#allocation8 + $0x108] sm:$0xff]  ;;  %v241_v61 = vld [vmem:[#allocation8 + $0x110] sm:$0xff]  ;;  %vm841_vm6 = vcmp.gt.s32.totalorder %v4208_v35, 2 }
  0x33   :  { %3366 = vmatprep.subr.bf16.mxu0 %v4103_v4  ;;  %v1818_v57 = vsel %vm1817_vm4, 1, %v4106_v11  ;;  %v4243_v58 = vpack.c.bf16 %v167_v54, %v166_v53  ;;  %v4246_v59 = vld [vmem:[#allocation2] sm:$0xff]  ;;  %v4248_v60 = vpack.c.bf16 %v240_v56, %v239_v55  ;;  %v243_v0 = vld [vmem:[#allocation8 + $0x120] sm:$0xff]  ;;  %v244_v1 = vld [vmem:[#allocation8 + $0x128] sm:$0xff]  ;;  %vm1085_vm7 = vcmp.gt.s32.totalorder %v4208_v35, 3 }
  0x34   :  { %3389 = vmatpush3.bf16.msra.mxu1 %v4190_v23  ;;  %v242_v62 = vld [vmem:[#allocation8 + $0x118] sm:$0xff]  ;;  %v4266_v2 = vpack.c.bf16 %v244_v1, %v243_v0  ;;  %v245_v3 = vld [vmem:[#allocation8 + $0x130] sm:$0xff]  ;;  %v247_v10 = vld [vmem:[#allocation8 + $0x140] sm:$0xff]  ;;  %vm1573_vm8 = vcmp.gt.s32.totalorder %v4208_v35, 5  ;;  %vm2061_vm9 = vcmp.gt.s32.totalorder %v4208_v35, 7 }
  0x35   :  { %3390 = vmatprep.subr.bf16.mxu1 %v4103_v4  ;;  %v4255_v63 = vpack.c.bf16 %v242_v62, %v241_v61  ;;  %v246_v6 = vld [vmem:[#allocation8 + $0x138] sm:$0xff]  ;;  %v248_v12 = vld [vmem:[#allocation8 + $0x148] sm:$0xff]  ;;  %v249_v15 = vld [vmem:[#allocation8 + $0x150] sm:$0xff] }
  0x36   :  { %3368 = vmatpush3.bf16.msra.mxu0 %v4193_v24  ;;  %600 = vperm.xlu0 %3943, %v598_v43   ;;  %v4272_v9 = vpack.c.bf16 %v246_v6, %v245_v3  ;;  %v4278_v13 = vpack.c.bf16 %v248_v12, %v247_v10  ;;  %v250_v16 = vld [vmem:[#allocation8 + $0x158] sm:$0xff]  ;;  %v251_v20 = vld [vmem:[#allocation8 + $0x160] sm:$0xff]  ;;  %v252_v21 = vld [vmem:[#allocation8 + $0x168] sm:$0xff] }
  0x37   :  { %3369 = vmatprep.subr.bf16.mxu0 %v4103_v4  ;;  %v4284_v19 = vpack.c.bf16 %v250_v16, %v249_v15  ;;  %v4290_v22 = vpack.c.bf16 %v252_v21, %v251_v20  ;;  %v253_v25 = vld [vmem:[#allocation8 + $0x170] sm:$0xff]  ;;  %v254_v26 = vld [vmem:[#allocation8 + $0x178] sm:$0xff]  ;;  %v62_v28 = vld [vmem:[#allocation5] sm:$0xff]  ;;  %v1086_v16 = vsel %vm1085_vm7, 1, %v4106_v11  ;;  %v1574_v20 = vsel %vm1573_vm8, 1, %v4106_v11 }
  0x38   :  { %3392 = vmatpush3.bf16.msra.mxu1 %v4198_v29  ;;  %v4296_v27 = vpack.c.bf16 %v254_v26, %v253_v25  ;;  %v63_v40 = vld [vmem:[#allocation5 + $0x8] sm:$0xff]  ;;  %v4328_v49 = vld [vmem:[%s4747_s4] ss:$0 sm:$0xff]  ;;  %v64_v56 = vld [vmem:[#allocation5 + $0x10] sm:$0xff]  ;;  %v2062_v21 = vsel %vm2061_vm9, 1, %v4106_v11 }
  0x39   :  { %3393 = vmatprep.subr.bf16.mxu1 %v4103_v4  ;;  %v361_v25 = vld [vmem:[#allocation5 + $0x18] sm:$0xff] }
  0x3a   :  { %3371 = vmatpush3.bf16.msra.mxu0 %v4201_v30  ;;  %1332 = vperm.xlu0 %3943, %v1330_v50  }
  0x3b   :  { %3372 = vmatprep.subr.bf16.mxu0 %v4103_v4 }
  0x3c   :  { %3395 = vmatpush3.bf16.msra.mxu1 %v4212_v36 }
  0x3d   :  { %3396 = vmatprep.subr.bf16.mxu1 %v4103_v4 }
  0x3e   :  { %3374 = vmatpush3.bf16.msra.mxu0 %v4217_v38  ;;  %1820 = vperm.xlu0 %3943, %v1818_v57  }
  0x3f   :  { %3375 = vmatprep.subr.bf16.mxu0 %v4103_v4 }
  0x40   :  { %3398 = vmatpush3.bf16.msra.mxu1 %v4223_v44 }
  0x41   :  { %3399 = vmatprep.subr.bf16.mxu1 %v4103_v4 }
  0x42   :  { %3377 = vmatpush3.bf16.msra.mxu0 %v4227_v45 }
  0x43   :  { %3378 = vmatprep.subr.bf16.mxu0 %v4103_v4 }
  0x44   :  { %3401 = vmatpush3.bf16.msra.mxu1 %v4233_v51 }
  0x45   :  { %3402 = vmatprep.subr.bf16.mxu1 %v4103_v4 }
  0x46   :  { %3380 = vmatpush3.bf16.msra.mxu0 %v4237_v52 }
  0x47   :  { %3405 = vmatprep.subr.bf16.mxu0 %v4103_v4 }
  0x48   :  { %3404 = vmatpush3.bf16.msra.mxu1 %v4243_v58 }
  0x49   :  { %2550 = vmatmul.mubr.f32.vlgmr.msra.gmra.mrb[0].mxu0 %v4246_v59  ;;  %3429 = vmatprep.subr.bf16.mxu1 %v4103_v4 }
  0x4a   :  { %3407 = vmatpush3.bf16.msra.mxu0 %v4248_v60  ;;  %2619 = vmatprep.mubr.msk.f32.mxu0 %vm4104_vm0, %v4105_v7 }
  0x4b   :  { %3408 = vmatprep.subr.bf16.mxu0 %v4103_v4  ;;  %2585 = vmatmul.mubr.f32.vlgmr.msra.gmra.mrb[0].mxu1 %v4246_v59 }
  0x4c   :  { %3431 = vmatpush3.bf16.msra.mxu1 %v4166_v5  ;;  %2654 = vmatprep.mubr.msk.f32.mxu1 %vm4104_vm0, %v4105_v7 }
  0x4d   :  { %3432 = vmatprep.subr.bf16.mxu1 %v4103_v4 }
  0x4e   :  { %3410 = vmatpush3.bf16.msra.mxu0 %v4255_v63 }
  0x4f   :  { %3411 = vmatprep.subr.bf16.mxu0 %v4103_v4 }
  0x50   :  { %3434 = vmatpush3.bf16.msra.mxu1 %v4174_v8 }
  0x51   :  { %3435 = vmatprep.subr.bf16.mxu1 %v4103_v4 }
  0x52   :  { %3413 = vmatpush3.bf16.msra.mxu0 %v4266_v2 }
  0x53   :  { %3414 = vmatprep.subr.bf16.mxu0 %v4103_v4 }
  0x54   :  { %3437 = vmatpush3.bf16.msra.mxu1 %v4185_v18 }
  0x55   :  { %3438 = vmatprep.subr.bf16.mxu1 %v4103_v4 }
  0x56   :  { %3416 = vmatpush3.bf16.msra.mxu0 %v4272_v9 }
  0x57   :  { %3417 = vmatprep.subr.bf16.mxu0 %v4103_v4 }
  0x58   :  { %3440 = vmatpush3.bf16.msra.mxu1 %v4193_v24 }
  0x59   :  { %3441 = vmatprep.subr.bf16.mxu1 %v4103_v4 }
  0x5a   :  { %3419 = vmatpush3.bf16.msra.mxu0 %v4278_v13 }
  0x5b   :  { %3420 = vmatprep.subr.bf16.mxu0 %v4103_v4 }
  0x5c   :  { %3443 = vmatpush3.bf16.msra.mxu1 %v4201_v30 }
  0x5d   :  { %3444 = vmatprep.subr.bf16.mxu1 %v4103_v4 }
  0x5e   :  { %3422 = vmatpush3.bf16.msra.mxu0 %v4284_v19 }
  0x5f   :  { %3423 = vmatprep.subr.bf16.mxu0 %v4103_v4 }
  0x60   :  { %3446 = vmatpush3.bf16.msra.mxu1 %v4217_v38 }
  0x61   :  { %3447 = vmatprep.subr.bf16.mxu1 %v4103_v4 }
  0x62   :  { %3425 = vmatpush3.bf16.msra.mxu0 %v4290_v22 }
  0x63   :  { %3426 = vmatprep.subr.bf16.mxu0 %v4103_v4 }
  0x64   :  { %3449 = vmatpush3.bf16.msra.mxu1 %v4227_v45 }
  0x65   :  { %3450 = vmatprep.subr.bf16.mxu1 %v4103_v4 }
  0x66   :  { %3428 = vmatpush3.bf16.msra.mxu0 %v4296_v27 }
  0x67   :  { %3453 = vmatprep.subr.bf16.mxu0 %v4103_v4 }
  0x68   :  { %3452 = vmatpush3.bf16.msra.mxu1 %v4237_v52 }
  0x69   :  { %2620 = vmatmul.mubr.f32.vlgmr.msra.gmra.mrb[2].mxu0 %v4246_v59  ;;  %3477 = vmatprep.subr.bf16.mxu1 %v4103_v4 }
  0x6a   :  { %3455 = vmatpush3.bf16.msra.mxu0 %v4178_v14  ;;  %2689 = vmatprep.mubr.msk.f32.mxu0 %vm4104_vm0, %v4105_v7 }
  0x6b   :  { %3456 = vmatprep.subr.bf16.mxu0 %v4103_v4 }
  0x6e   :  { %3458 = vmatpush3.bf16.msra.mxu0 %v4182_v17 }
  0x6f   :  { %3459 = vmatprep.subr.bf16.mxu0 %v4103_v4 }
  0x72   :  { %3461 = vmatpush3.bf16.msra.mxu0 %v4190_v23 }
  0x73   :  { %3462 = vmatprep.subr.bf16.mxu0 %v4103_v4 }
  0x76   :  { %3464 = vmatpush3.bf16.msra.mxu0 %v4198_v29 }
  0x77   :  { %3465 = vmatprep.subr.bf16.mxu0 %v4103_v4 }
  0x7a   :  { %3467 = vmatpush3.bf16.msra.mxu0 %v4212_v36 }
  0x7b   :  { %3468 = vmatprep.subr.bf16.mxu0 %v4103_v4 }
  0x7e   :  { %3470 = vmatpush3.bf16.msra.mxu0 %v4223_v44 }
  0x7f   :  { %3471 = vmatprep.subr.bf16.mxu0 %v4103_v4 }
  0x82   :  { %3473 = vmatpush3.bf16.msra.mxu0 %v4233_v51 }
  0x83   :  { %3474 = vmatprep.subr.bf16.mxu0 %v4103_v4 }
  0x86   :  { %3476 = vmatpush3.bf16.msra.mxu0 %v4243_v58 }
  0x87   :  { %3501 = vmatprep.subr.bf16.mxu0 %v4103_v4 }
  0xb1   :  { %v357_v10 = vpop.permute.xlu0 %356 }
  0xb2   :  { %vm358_vm5 = vcmp.eq.s32.totalorder %v357_v10, 1 }
 0x11c   :  { %v147_v31 = vpop.f32.mrb[0].mxu0 }
 0x11d   :  { %v255_v32 = vadd.f32 %v147_v31, %v62_v28  ;;  %v2551_v33 = vpop.f32.mrb[1].mxu0 }
 0x11e   :  { %v234_v37 = vpop.f32.mrb[0].mxu1 }
 0x11f   :  { %v2092_v34 = vmul.f32 -1.442695, %v255_v32  ;;  %v2586_v39 = vpop.f32.mrb[1].mxu1  ;;  %v262_v41 = vadd.f32 %v234_v37, %v63_v40  ;;  %v362_v37 = vld [vmem:[#allocation5 + $0x20] sm:$0xff] }
 0x121   :  { %3945 = vpow2.f32 %v2092_v34  ;;  %v2093_v42 = vmul.f32 -1.442695, %v262_v41 }
 0x123   :  { %3947 = vpow2.f32 %v2093_v42 }
 0x12b   :  { %v3946_v43 = vpop.eup %3945 }
 0x12c   :  { %v259_v46 = vadd.f32 1.0, %v3946_v43 }
 0x12d   :  { %v3948_v47 = vpop.eup %3947 }
 0x12e   :  { %3949 = vrcp.f32 %v259_v46  ;;  %v266_v48 = vadd.f32 1.0, %v3948_v47 }
 0x130   :  { %3951 = vrcp.f32 %v266_v48 }
 0x138   :  { %v3950_v55 = vpop.eup %3949 }
 0x13a   :  { %v3952_v62 = vpop.eup %3951 }
 0x13b   :  { %v348_v0 = vsub.f32 1.0, %v3952_v62  ;;  %v350_v6 = vmul.f32 %v3952_v62, %v4246_v59 }
 0x13c   :  { %v341_v50 = vpop.f32.mrb[2].mxu0 }
 0x13d   :  { %v342_v53 = vadd.f32 %v4328_v49, %v341_v50  ;;  %v2621_v54 = vpop.f32.mrb[3].mxu0  ;;  %v363_v50 = vld [vmem:[#allocation5 + $0x28] sm:$0xff] }
 0x13f   :  { %v345_v57 = vmul.f32 %v3950_v55, %v342_v53 }
 0x141   :  { %v346_v61 = vadd.f32 %v345_v57, %v64_v56 }
 0x143   :  { %3953 = vtanh.f32 %v346_v61 }
 0x14d   :  { %v3954_v1 = vpop.eup %3953 }
 0x14e   :  { %v349_v3 = vmul.f32 %v3954_v1, %v348_v0  ;;  %v601_v0 = vpop.permute.xlu0 %600 }
 0x14f   :  { %vm602_vm10 = vcmp.eq.s32.totalorder %v601_v0, 1 }
 0x150   :  { %v351_v12 = vadd.f32 %v350_v6, %v349_v3  ;;  %v605_v6 = vld [vmem:[#allocation5 + $0x30] sm:$0xff] }
 0x152   :  { %v4333_v15 = vsel %vm358_vm5, %v351_v12, %v4246_v59  ;;  %v842_v59 = vsel %vm841_vm6, 1, %v4106_v11 }
 0x153   :  { %2655 = vmatmul.mubr.f32.vlgmr.msra.gmra.mrb[2].mxu1 %v4333_v15  ;;  %2690 = vmatmul.mubr.f32.vlgmr.msra.gmra.mrb[4].mxu0 %v4333_v15 }
 0x154   :  { %3479 = vmatpush3.bf16.msra.mxu1 %v4248_v60  ;;  %2724 = vmatprep.mubr.msk.f32.mxu1 %vm4104_vm0, %v4105_v7 }
 0x155   :  { %3480 = vmatprep.subr.bf16.mxu1 %v4103_v4  ;;  %3503 = vmatpush3.bf16.msra.mxu0 %v4166_v5 }
 0x156   :  { %3504 = vmatprep.subr.bf16.mxu0 %v4103_v4  ;;  %2759 = vmatprep.mubr.msk.f32.mxu0 %vm4104_vm0, %v4105_v7 }
 0x157   :  { %844 = vperm.xlu1 %3944, %v842_v59  }
 0x158   :  { %3482 = vmatpush3.bf16.msra.mxu1 %v4255_v63 }
 0x159   :  { %3483 = vmatprep.subr.bf16.mxu1 %v4103_v4  ;;  %3506 = vmatpush3.bf16.msra.mxu0 %v4174_v8 }
 0x15a   :  { %3507 = vmatprep.subr.bf16.mxu0 %v4103_v4 }
 0x15b   :  { %1088 = vperm.xlu1 %3944, %v1086_v16  }
 0x15c   :  { %3485 = vmatpush3.bf16.msra.mxu1 %v4266_v2 }
 0x15d   :  { %3486 = vmatprep.subr.bf16.mxu1 %v4103_v4  ;;  %3509 = vmatpush3.bf16.msra.mxu0 %v4185_v18 }
 0x15e   :  { %3510 = vmatprep.subr.bf16.mxu0 %v4103_v4 }
 0x15f   :  { %1576 = vperm.xlu1 %3944, %v1574_v20  }
 0x160   :  { %3488 = vmatpush3.bf16.msra.mxu1 %v4272_v9 }
 0x161   :  { %3489 = vmatprep.subr.bf16.mxu1 %v4103_v4  ;;  %3512 = vmatpush3.bf16.msra.mxu0 %v4193_v24 }
 0x162   :  { %3513 = vmatprep.subr.bf16.mxu0 %v4103_v4 }
 0x163   :  { %2064 = vperm.xlu1 %3944, %v2062_v21   ;;  %v606_v21 = vld [vmem:[#allocation5 + $0x38] sm:$0xff] }
 0x164   :  { %3491 = vmatpush3.bf16.msra.mxu1 %v4278_v13 }
 0x165   :  { %3492 = vmatprep.subr.bf16.mxu1 %v4103_v4  ;;  %3515 = vmatpush3.bf16.msra.mxu0 %v4201_v30 }
 0x166   :  { %3516 = vmatprep.subr.bf16.mxu0 %v4103_v4 }
 0x168   :  { %3494 = vmatpush3.bf16.msra.mxu1 %v4284_v19 }
 0x169   :  { %3495 = vmatprep.subr.bf16.mxu1 %v4103_v4  ;;  %3518 = vmatpush3.bf16.msra.mxu0 %v4217_v38 }
 0x16a   :  { %3519 = vmatprep.subr.bf16.mxu0 %v4103_v4 }
 0x16c   :  { %3497 = vmatpush3.bf16.msra.mxu1 %v4290_v22 }
 0x16d   :  { %3498 = vmatprep.subr.bf16.mxu1 %v4103_v4  ;;  %3521 = vmatpush3.bf16.msra.mxu0 %v4227_v45 }
 0x16e   :  { %3522 = vmatprep.subr.bf16.mxu0 %v4103_v4 }
 0x170   :  { %3500 = vmatpush3.bf16.msra.mxu1 %v4296_v27 }
 0x171   :  { %3525 = vmatprep.subr.bf16.mxu1 %v4103_v4  ;;  %3524 = vmatpush3.bf16.msra.mxu0 %v4237_v52 }
 0x172   :  { %3549 = vmatprep.subr.bf16.mxu0 %v4103_v4 }
 0x173   :  { %2725 = vmatmul.mubr.f32.vlgmr.msra.gmra.mrb[4].mxu1 %v4333_v15 }
 0x174   :  { %3527 = vmatpush3.bf16.msra.mxu1 %v4178_v14  ;;  %2794 = vmatprep.mubr.msk.f32.mxu1 %vm4104_vm0, %v4105_v7 }
 0x175   :  { %3528 = vmatprep.subr.bf16.mxu1 %v4103_v4 }
 0x178   :  { %3530 = vmatpush3.bf16.msra.mxu1 %v4182_v17 }
 0x179   :  { %3531 = vmatprep.subr.bf16.mxu1 %v4103_v4 }
 0x17c   :  { %3533 = vmatpush3.bf16.msra.mxu1 %v4190_v23 }
 0x17d   :  { %3534 = vmatprep.subr.bf16.mxu1 %v4103_v4 }
 0x180   :  { %3536 = vmatpush3.bf16.msra.mxu1 %v4198_v29 }
 0x181   :  { %3537 = vmatprep.subr.bf16.mxu1 %v4103_v4 }
 0x184   :  { %3539 = vmatpush3.bf16.msra.mxu1 %v4212_v36 }
 0x185   :  { %3540 = vmatprep.subr.bf16.mxu1 %v4103_v4 }
 0x188   :  { %3542 = vmatpush3.bf16.msra.mxu1 %v4223_v44 }
 0x189   :  { %3543 = vmatprep.subr.bf16.mxu1 %v4103_v4 }
 0x18c   :  { %3545 = vmatpush3.bf16.msra.mxu1 %v4233_v51 }
 0x18d   :  { %3546 = vmatprep.subr.bf16.mxu1 %v4103_v4 }
 0x190   :  { %3548 = vmatpush3.bf16.msra.mxu1 %v4243_v58 }
 0x191   :  { %3573 = vmatprep.subr.bf16.mxu1 %v4103_v4 }
 0x226   :  { %v430_v26 = vpop.f32.mrb[2].mxu1  ;;  %v500_v28 = vpop.f32.mrb[4].mxu0 }
 0x227   :  { %v504_v31 = vadd.f32 %v430_v26, %v361_v25  ;;  %v2656_v32 = vpop.f32.mrb[3].mxu1  ;;  %v2691_v33 = vpop.f32.mrb[5].mxu0  ;;  %v511_v39 = vadd.f32 %v500_v28, %v362_v37 }
 0x229   :  { %v2095_v34 = vmul.f32 -1.442695, %v504_v31  ;;  %v2096_v40 = vmul.f32 -1.442695, %v511_v39 }
 0x22b   :  { %3955 = vpow2.f32 %v2095_v34 }
 0x22c   :  { %3957 = vpow2.f32 %v2096_v40 }
 0x235   :  { %v3956_v41 = vpop.eup %3955 }
 0x236   :  { %v508_v42 = vadd.f32 1.0, %v3956_v41  ;;  %v3958_v35 = vpop.eup %3957  ;;  %v607_v41 = vld [vmem:[#allocation5 + $0x40] sm:$0xff] }
 0x237   :  { %v515_v43 = vadd.f32 1.0, %v3958_v35 }
 0x238   :  { %3959 = vrcp.f32 %v508_v42 }
 0x239   :  { %3961 = vrcp.f32 %v515_v43 }
 0x242   :  { %v3960_v48 = vpop.eup %3959 }
 0x243   :  { %v3962_v55 = vpop.eup %3961 }
 0x244   :  { %v591_v56 = vsub.f32 1.0, %v3962_v55  ;;  %v593_v62 = vmul.f32 %v3962_v55, %v4333_v15  ;;  %v849_v55 = vld [vmem:[#allocation5 + $0x48] sm:$0xff] }
 0x246   :  { %v584_v46 = vpop.f32.mrb[4].mxu1 }
 0x247   :  { %v585_v11 = vadd.f32 %v4328_v49, %v584_v46  ;;  %v2726_v47 = vpop.f32.mrb[5].mxu1 }
 0x248   :  { %v845_v47 = vpop.permute.xlu1 %844 }
 0x249   :  { %v588_v53 = vmul.f32 %v3960_v48, %v585_v11  ;;  %vm846_vm11 = vcmp.eq.s32.totalorder %v845_v47, 1 }
 0x24b   :  { %v589_v54 = vadd.f32 %v588_v53, %v363_v50 }
 0x24d   :  { %3963 = vtanh.f32 %v589_v54 }
 0x257   :  { %v3964_v57 = vpop.eup %3963 }
 0x258   :  { %v592_v61 = vmul.f32 %v3964_v57, %v591_v56 }
 0x25a   :  { %v594_v1 = vadd.f32 %v593_v62, %v592_v61 }
 0x25c   :  { %v4403_v3 = vsel %vm602_vm10, %v594_v1, %v4333_v15 }
 0x25d   :  { %2760 = vmatmul.mubr.f32.vlgmr.msra.gmra.mrb[6].mxu0 %v4403_v3  ;;  %2795 = vmatmul.mubr.f32.vlgmr.msra.gmra.mrb[6].mxu1 %v4403_v3 }
 0x25e   :  { %3551 = vmatpush3.bf16.msra.mxu0 %v4248_v60  ;;  %2829 = vmatprep.mubr.msk.f32.mxu0 %vm4104_vm0, %v4105_v7 }
 0x25f   :  { %3552 = vmatprep.subr.bf16.mxu0 %v4103_v4  ;;  %3575 = vmatpush3.bf16.msra.mxu1 %v4166_v5 }
 0x260   :  { %3576 = vmatprep.subr.bf16.mxu1 %v4103_v4  ;;  %2864 = vmatprep.mubr.msk.f32.mxu1 %vm4104_vm0, %v4105_v7 }
 0x262   :  { %3554 = vmatpush3.bf16.msra.mxu0 %v4255_v63 }
 0x263   :  { %3555 = vmatprep.subr.bf16.mxu0 %v4103_v4  ;;  %3578 = vmatpush3.bf16.msra.mxu1 %v4174_v8 }
 0x264   :  { %3579 = vmatprep.subr.bf16.mxu1 %v4103_v4 }
 0x266   :  { %3557 = vmatpush3.bf16.msra.mxu0 %v4266_v2 }
 0x267   :  { %3558 = vmatprep.subr.bf16.mxu0 %v4103_v4  ;;  %3581 = vmatpush3.bf16.msra.mxu1 %v4185_v18 }
 0x268   :  { %3582 = vmatprep.subr.bf16.mxu1 %v4103_v4 }
 0x26a   :  { %3560 = vmatpush3.bf16.msra.mxu0 %v4272_v9 }
 0x26b   :  { %3561 = vmatprep.subr.bf16.mxu0 %v4103_v4  ;;  %3584 = vmatpush3.bf16.msra.mxu1 %v4193_v24 }
 0x26c   :  { %3585 = vmatprep.subr.bf16.mxu1 %v4103_v4 }
 0x26e   :  { %3563 = vmatpush3.bf16.msra.mxu0 %v4278_v13 }
 0x26f   :  { %3564 = vmatprep.subr.bf16.mxu0 %v4103_v4  ;;  %3587 = vmatpush3.bf16.msra.mxu1 %v4201_v30 }
 0x270   :  { %3588 = vmatprep.subr.bf16.mxu1 %v4103_v4 }
 0x272   :  { %3566 = vmatpush3.bf16.msra.mxu0 %v4284_v19 }
 0x273   :  { %3567 = vmatprep.subr.bf16.mxu0 %v4103_v4  ;;  %3590 = vmatpush3.bf16.msra.mxu1 %v4217_v38 }
 0x274   :  { %3591 = vmatprep.subr.bf16.mxu1 %v4103_v4 }
 0x276   :  { %3569 = vmatpush3.bf16.msra.mxu0 %v4290_v22 }
 0x277   :  { %3570 = vmatprep.subr.bf16.mxu0 %v4103_v4  ;;  %3593 = vmatpush3.bf16.msra.mxu1 %v4227_v45 }
 0x278   :  { %3594 = vmatprep.subr.bf16.mxu1 %v4103_v4 }
 0x27a   :  { %3572 = vmatpush3.bf16.msra.mxu0 %v4296_v27 }
 0x27b   :  { %3597 = vmatprep.subr.bf16.mxu0 %v4103_v4  ;;  %3596 = vmatpush3.bf16.msra.mxu1 %v4237_v52 }
 0x27c   :  { %3621 = vmatprep.subr.bf16.mxu1 %v4103_v4 }
 0x27d   :  { %2830 = vmatmul.mubr.f32.vlgmr.msra.gmra.mrb[8].mxu0 %v4403_v3 }
 0x27e   :  { %3599 = vmatpush3.bf16.msra.mxu0 %v4178_v14  ;;  %2899 = vmatprep.mubr.msk.f32.mxu0 %vm4104_vm0, %v4105_v7 }
 0x27f   :  { %3600 = vmatprep.subr.bf16.mxu0 %v4103_v4 }
 0x282   :  { %3602 = vmatpush3.bf16.msra.mxu0 %v4182_v17 }
 0x283   :  { %3603 = vmatprep.subr.bf16.mxu0 %v4103_v4 }
 0x286   :  { %3605 = vmatpush3.bf16.msra.mxu0 %v4190_v23 }
 0x287   :  { %3606 = vmatprep.subr.bf16.mxu0 %v4103_v4 }
 0x28a   :  { %3608 = vmatpush3.bf16.msra.mxu0 %v4198_v29 }
 0x28b   :  { %3609 = vmatprep.subr.bf16.mxu0 %v4103_v4 }
 0x28e   :  { %3611 = vmatpush3.bf16.msra.mxu0 %v4212_v36 }
 0x28f   :  { %3612 = vmatprep.subr.bf16.mxu0 %v4103_v4 }
 0x292   :  { %3614 = vmatpush3.bf16.msra.mxu0 %v4223_v44 }
 0x293   :  { %3615 = vmatprep.subr.bf16.mxu0 %v4103_v4 }
 0x296   :  { %3617 = vmatpush3.bf16.msra.mxu0 %v4233_v51 }
 0x297   :  { %3618 = vmatprep.subr.bf16.mxu0 %v4103_v4 }
 0x29a   :  { %3620 = vmatpush3.bf16.msra.mxu0 %v4243_v58 }
 0x29b   :  { %3645 = vmatprep.subr.bf16.mxu0 %v4103_v4 }
 0x330   :  { %v674_v10 = vpop.f32.mrb[6].mxu0  ;;  %v744_v12 = vpop.f32.mrb[6].mxu1 }
 0x331   :  { %v748_v15 = vadd.f32 %v674_v10, %v605_v6  ;;  %v2761_v59 = vpop.f32.mrb[7].mxu0  ;;  %v2796_v16 = vpop.f32.mrb[7].mxu1  ;;  %v755_v25 = vadd.f32 %v744_v12, %v606_v21 }
 0x333   :  { %v2097_v20 = vmul.f32 -1.442695, %v748_v15  ;;  %v2098_v26 = vmul.f32 -1.442695, %v755_v25 }
 0x335   :  { %3965 = vpow2.f32 %v2097_v20 }
 0x336   :  { %3967 = vpow2.f32 %v2098_v26 }
 0x33f   :  { %v3966_v28 = vpop.eup %3965 }
 0x340   :  { %v752_v31 = vadd.f32 1.0, %v3966_v28  ;;  %v3968_v32 = vpop.eup %3967  ;;  %v851_v28 = vld [vmem:[#allocation5 + $0x58] sm:$0xff] }
 0x341   :  { %v759_v33 = vadd.f32 1.0, %v3968_v32 }
 0x342   :  { %3969 = vrcp.f32 %v752_v31 }
 0x343   :  { %3971 = vrcp.f32 %v759_v33 }
 0x34c   :  { %v3970_v40 = vpop.eup %3969 }
 0x34d   :  { %v3972_v43 = vpop.eup %3971 }
 0x34e   :  { %v835_v46 = vsub.f32 1.0, %v3972_v43  ;;  %v837_v50 = vmul.f32 %v3972_v43, %v4403_v3  ;;  %v1093_v43 = vld [vmem:[#allocation5 + $0x60] sm:$0xff] }
 0x350   :  { %v828_v34 = vpop.f32.mrb[8].mxu0 }
 0x351   :  { %v829_v37 = vadd.f32 %v4328_v49, %v828_v34  ;;  %v2831_v39 = vpop.f32.mrb[9].mxu0 }
 0x353   :  { %v832_v42 = vmul.f32 %v3970_v40, %v829_v37 }
 0x355   :  { %v833_v35 = vadd.f32 %v832_v42, %v607_v41  ;;  %v1089_v41 = vpop.permute.xlu1 %1088 }
 0x356   :  { %vm1090_vm12 = vcmp.eq.s32.totalorder %v1089_v41, 1 }
 0x357   :  { %3973 = vtanh.f32 %v833_v35 }
 0x361   :  { %v3974_v11 = vpop.eup %3973 }
 0x362   :  { %v836_v48 = vmul.f32 %v3974_v11, %v835_v46 }
 0x364   :  { %v838_v53 = vadd.f32 %v837_v50, %v836_v48 }
 0x366   :  { %v4465_v54 = vsel %vm846_vm11, %v838_v53, %v4403_v3  ;;  %v850_v3 = vld [vmem:[#allocation5 + $0x50] sm:$0xff] }
 0x367   :  { %2865 = vmatmul.mubr.f32.vlgmr.msra.gmra.mrb[8].mxu1 %v4465_v54  ;;  %2900 = vmatmul.mubr.f32.vlgmr.msra.gmra.mrb[10].mxu0 %v4465_v54 }
 0x368   :  { %3623 = vmatpush3.bf16.msra.mxu1 %v4248_v60  ;;  %2934 = vmatprep.mubr.msk.f32.mxu1 %vm4104_vm0, %v4105_v7 }
 0x369   :  { %3624 = vmatprep.subr.bf16.mxu1 %v4103_v4  ;;  %3647 = vmatpush3.bf16.msra.mxu0 %v4166_v5 }
 0x36a   :  { %3648 = vmatprep.subr.bf16.mxu0 %v4103_v4  ;;  %2969 = vmatprep.mubr.msk.f32.mxu0 %vm4104_vm0, %v4105_v7 }
 0x36c   :  { %3626 = vmatpush3.bf16.msra.mxu1 %v4255_v63 }
 0x36d   :  { %3627 = vmatprep.subr.bf16.mxu1 %v4103_v4  ;;  %3650 = vmatpush3.bf16.msra.mxu0 %v4174_v8 }
 0x36e   :  { %3651 = vmatprep.subr.bf16.mxu0 %v4103_v4 }
 0x370   :  { %3629 = vmatpush3.bf16.msra.mxu1 %v4266_v2 }
 0x371   :  { %3630 = vmatprep.subr.bf16.mxu1 %v4103_v4  ;;  %3653 = vmatpush3.bf16.msra.mxu0 %v4185_v18 }
 0x372   :  { %3654 = vmatprep.subr.bf16.mxu0 %v4103_v4 }
 0x374   :  { %3632 = vmatpush3.bf16.msra.mxu1 %v4272_v9 }
 0x375   :  { %3633 = vmatprep.subr.bf16.mxu1 %v4103_v4  ;;  %3656 = vmatpush3.bf16.msra.mxu0 %v4193_v24 }
 0x376   :  { %3657 = vmatprep.subr.bf16.mxu0 %v4103_v4 }
 0x378   :  { %3635 = vmatpush3.bf16.msra.mxu1 %v4278_v13 }
 0x379   :  { %3636 = vmatprep.subr.bf16.mxu1 %v4103_v4  ;;  %3659 = vmatpush3.bf16.msra.mxu0 %v4201_v30 }
 0x37a   :  { %3660 = vmatprep.subr.bf16.mxu0 %v4103_v4 }
 0x37c   :  { %3638 = vmatpush3.bf16.msra.mxu1 %v4284_v19 }
 0x37d   :  { %3639 = vmatprep.subr.bf16.mxu1 %v4103_v4  ;;  %3662 = vmatpush3.bf16.msra.mxu0 %v4217_v38 }
 0x37e   :  { %3663 = vmatprep.subr.bf16.mxu0 %v4103_v4 }
 0x380   :  { %3641 = vmatpush3.bf16.msra.mxu1 %v4290_v22 }
 0x381   :  { %3642 = vmatprep.subr.bf16.mxu1 %v4103_v4  ;;  %3665 = vmatpush3.bf16.msra.mxu0 %v4227_v45 }
 0x382   :  { %3666 = vmatprep.subr.bf16.mxu0 %v4103_v4 }
 0x384   :  { %3644 = vmatpush3.bf16.msra.mxu1 %v4296_v27 }
 0x385   :  { %3669 = vmatprep.subr.bf16.mxu1 %v4103_v4  ;;  %3668 = vmatpush3.bf16.msra.mxu0 %v4237_v52 }
 0x386   :  { %3693 = vmatprep.subr.bf16.mxu0 %v4103_v4 }
 0x387   :  { %2935 = vmatmul.mubr.f32.vlgmr.msra.gmra.mrb[10].mxu1 %v4465_v54 }
 0x388   :  { %3671 = vmatpush3.bf16.msra.mxu1 %v4178_v14  ;;  %3004 = vmatprep.mubr.msk.f32.mxu1 %vm4104_vm0, %v4105_v7 }
 0x389   :  { %3672 = vmatprep.subr.bf16.mxu1 %v4103_v4 }
 0x38c   :  { %3674 = vmatpush3.bf16.msra.mxu1 %v4182_v17 }
 0x38d   :  { %3675 = vmatprep.subr.bf16.mxu1 %v4103_v4 }
 0x390   :  { %3677 = vmatpush3.bf16.msra.mxu1 %v4190_v23 }
 0x391   :  { %3678 = vmatprep.subr.bf16.mxu1 %v4103_v4 }
 0x394   :  { %3680 = vmatpush3.bf16.msra.mxu1 %v4198_v29 }
 0x395   :  { %3681 = vmatprep.subr.bf16.mxu1 %v4103_v4 }
 0x398   :  { %3683 = vmatpush3.bf16.msra.mxu1 %v4212_v36 }
 0x399   :  { %3684 = vmatprep.subr.bf16.mxu1 %v4103_v4 }
 0x39c   :  { %3686 = vmatpush3.bf16.msra.mxu1 %v4223_v44 }
 0x39d   :  { %3687 = vmatprep.subr.bf16.mxu1 %v4103_v4 }
 0x3a0   :  { %3689 = vmatpush3.bf16.msra.mxu1 %v4233_v51 }
 0x3a1   :  { %3690 = vmatprep.subr.bf16.mxu1 %v4103_v4 }
 0x3a4   :  { %3692 = vmatpush3.bf16.msra.mxu1 %v4243_v58 }
 0x3a5   :  { %3717 = vmatprep.subr.bf16.mxu1 %v4103_v4 }
 0x43a   :  { %v918_v56 = vpop.f32.mrb[8].mxu1  ;;  %v988_v57 = vpop.f32.mrb[10].mxu0 }
 0x43b   :  { %v992_v61 = vadd.f32 %v918_v56, %v849_v55  ;;  %v2866_v62 = vpop.f32.mrb[9].mxu1  ;;  %v2901_v0 = vpop.f32.mrb[11].mxu0  ;;  %v999_v6 = vadd.f32 %v988_v57, %v850_v3 }
 0x43d   :  { %v2099_v1 = vmul.f32 -1.442695, %v992_v61  ;;  %v2100_v10 = vmul.f32 -1.442695, %v999_v6 }
 0x43f   :  { %3975 = vpow2.f32 %v2099_v1 }
 0x440   :  { %3977 = vpow2.f32 %v2100_v10 }
 0x449   :  { %v3976_v12 = vpop.eup %3975 }
 0x44a   :  { %v996_v15 = vadd.f32 1.0, %v3976_v12  ;;  %v3978_v59 = vpop.eup %3977  ;;  %v1095_v12 = vld [vmem:[#allocation5 + $0x70] sm:$0xff] }
 0x44b   :  { %v1003_v16 = vadd.f32 1.0, %v3978_v59 }
 0x44c   :  { %3979 = vrcp.f32 %v996_v15 }
 0x44d   :  { %3981 = vrcp.f32 %v1003_v16 }
 0x456   :  { %v3980_v26 = vpop.eup %3979 }
 0x457   :  { %v3982_v33 = vpop.eup %3981 }
 0x458   :  { %v1079_v34 = vsub.f32 1.0, %v3982_v33  ;;  %v1081_v40 = vmul.f32 %v3982_v33, %v4465_v54  ;;  %v1337_v33 = vld [vmem:[#allocation5 + $0x78] sm:$0xff] }
 0x45a   :  { %v1072_v20 = vpop.f32.mrb[10].mxu1 }
 0x45b   :  { %v1073_v21 = vadd.f32 %v4328_v49, %v1072_v20  ;;  %v2936_v25 = vpop.f32.mrb[11].mxu1 }
 0x45d   :  { %v1076_v31 = vmul.f32 %v3980_v26, %v1073_v21 }
 0x45f   :  { %v1077_v32 = vadd.f32 %v1076_v31, %v851_v28  ;;  %v1333_v28 = vpop.permute.xlu0 %1332 }
 0x460   :  { %vm1334_vm13 = vcmp.eq.s32.totalorder %v1333_v28, 1 }
 0x461   :  { %3983 = vtanh.f32 %v1077_v32 }
 0x46b   :  { %v3984_v37 = vpop.eup %3983 }
 0x46c   :  { %v1080_v39 = vmul.f32 %v3984_v37, %v1079_v34 }
 0x46e   :  { %v1082_v42 = vadd.f32 %v1081_v40, %v1080_v39 }
 0x470   :  { %v4527_v35 = vsel %vm1090_vm12, %v1082_v42, %v4465_v54  ;;  %v1094_v54 = vld [vmem:[#allocation5 + $0x68] sm:$0xff] }
 0x471   :  { %2970 = vmatmul.mubr.f32.vlgmr.msra.gmra.mrb[12].mxu0 %v4527_v35  ;;  %3005 = vmatmul.mubr.f32.vlgmr.msra.gmra.mrb[12].mxu1 %v4527_v35 }
 0x472   :  { %3695 = vmatpush3.bf16.msra.mxu0 %v4248_v60  ;;  %3039 = vmatprep.mubr.msk.f32.mxu0 %vm4104_vm0, %v4105_v7 }
 0x473   :  { %3696 = vmatprep.subr.bf16.mxu0 %v4103_v4  ;;  %3719 = vmatpush3.bf16.msra.mxu1 %v4166_v5 }
 0x474   :  { %3720 = vmatprep.subr.bf16.mxu1 %v4103_v4  ;;  %3074 = vmatprep.mubr.msk.f32.mxu1 %vm4104_vm0, %v4105_v7 }
 0x476   :  { %3698 = vmatpush3.bf16.msra.mxu0 %v4255_v63 }
 0x477   :  { %3699 = vmatprep.subr.bf16.mxu0 %v4103_v4  ;;  %3722 = vmatpush3.bf16.msra.mxu1 %v4174_v8 }
 0x478   :  { %3723 = vmatprep.subr.bf16.mxu1 %v4103_v4 }
 0x47a   :  { %3701 = vmatpush3.bf16.msra.mxu0 %v4266_v2 }
 0x47b   :  { %3702 = vmatprep.subr.bf16.mxu0 %v4103_v4  ;;  %3725 = vmatpush3.bf16.msra.mxu1 %v4185_v18 }
 0x47c   :  { %3726 = vmatprep.subr.bf16.mxu1 %v4103_v4 }
 0x47e   :  { %3704 = vmatpush3.bf16.msra.mxu0 %v4272_v9 }
 0x47f   :  { %3705 = vmatprep.subr.bf16.mxu0 %v4103_v4  ;;  %3728 = vmatpush3.bf16.msra.mxu1 %v4193_v24 }
 0x480   :  { %3729 = vmatprep.subr.bf16.mxu1 %v4103_v4 }
 0x482   :  { %3707 = vmatpush3.bf16.msra.mxu0 %v4278_v13 }
 0x483   :  { %3708 = vmatprep.subr.bf16.mxu0 %v4103_v4  ;;  %3731 = vmatpush3.bf16.msra.mxu1 %v4201_v30 }
 0x484   :  { %3732 = vmatprep.subr.bf16.mxu1 %v4103_v4 }
 0x486   :  { %3710 = vmatpush3.bf16.msra.mxu0 %v4284_v19 }
 0x487   :  { %3711 = vmatprep.subr.bf16.mxu0 %v4103_v4  ;;  %3734 = vmatpush3.bf16.msra.mxu1 %v4217_v38 }
 0x488   :  { %3735 = vmatprep.subr.bf16.mxu1 %v4103_v4 }
 0x48a   :  { %3713 = vmatpush3.bf16.msra.mxu0 %v4290_v22 }
 0x48b   :  { %3714 = vmatprep.subr.bf16.mxu0 %v4103_v4  ;;  %3737 = vmatpush3.bf16.msra.mxu1 %v4227_v45 }
 0x48c   :  { %3738 = vmatprep.subr.bf16.mxu1 %v4103_v4 }
 0x48e   :  { %3716 = vmatpush3.bf16.msra.mxu0 %v4296_v27 }
 0x48f   :  { %3741 = vmatprep.subr.bf16.mxu0 %v4103_v4  ;;  %3740 = vmatpush3.bf16.msra.mxu1 %v4237_v52 }
 0x490   :  { %3765 = vmatprep.subr.bf16.mxu1 %v4103_v4 }
 0x491   :  { %3040 = vmatmul.mubr.f32.vlgmr.msra.gmra.mrb[14].mxu0 %v4527_v35 }
 0x492   :  { %3743 = vmatpush3.bf16.msra.mxu0 %v4178_v14  ;;  %3109 = vmatprep.mubr.msk.f32.mxu0 %vm4104_vm0, %v4105_v7 }
 0x493   :  { %3744 = vmatprep.subr.bf16.mxu0 %v4103_v4 }
 0x496   :  { %3746 = vmatpush3.bf16.msra.mxu0 %v4182_v17 }
 0x497   :  { %3747 = vmatprep.subr.bf16.mxu0 %v4103_v4 }
 0x49a   :  { %3749 = vmatpush3.bf16.msra.mxu0 %v4190_v23 }
 0x49b   :  { %3750 = vmatprep.subr.bf16.mxu0 %v4103_v4 }
 0x49e   :  { %3752 = vmatpush3.bf16.msra.mxu0 %v4198_v29 }
 0x49f   :  { %3753 = vmatprep.subr.bf16.mxu0 %v4103_v4 }
 0x4a2   :  { %3755 = vmatpush3.bf16.msra.mxu0 %v4212_v36 }
 0x4a3   :  { %3756 = vmatprep.subr.bf16.mxu0 %v4103_v4 }
 0x4a6   :  { %3758 = vmatpush3.bf16.msra.mxu0 %v4223_v44 }
 0x4a7   :  { %3759 = vmatprep.subr.bf16.mxu0 %v4103_v4 }
 0x4aa   :  { %3761 = vmatpush3.bf16.msra.mxu0 %v4233_v51 }
 0x4ab   :  { %3762 = vmatprep.subr.bf16.mxu0 %v4103_v4 }
 0x4ae   :  { %3764 = vmatpush3.bf16.msra.mxu0 %v4243_v58 }
 0x4af   :  { %3789 = vmatprep.subr.bf16.mxu0 %v4103_v4 }
 0x544   :  { %v1162_v46 = vpop.f32.mrb[12].mxu0  ;;  %v1232_v11 = vpop.f32.mrb[12].mxu1 }
 0x545   :  { %v1236_v47 = vadd.f32 %v1162_v46, %v1093_v43  ;;  %v2971_v48 = vpop.f32.mrb[13].mxu0  ;;  %v3006_v50 = vpop.f32.mrb[13].mxu1  ;;  %v1243_v55 = vadd.f32 %v1232_v11, %v1094_v54 }
 0x547   :  { %v2101_v53 = vmul.f32 -1.442695, %v1236_v47  ;;  %v2102_v56 = vmul.f32 -1.442695, %v1243_v55 }
 0x549   :  { %3985 = vpow2.f32 %v2101_v53 }
 0x54a   :  { %3987 = vpow2.f32 %v2102_v56 }
 0x553   :  { %v3986_v57 = vpop.eup %3985 }
 0x554   :  { %v1240_v61 = vadd.f32 1.0, %v3986_v57  ;;  %v3988_v62 = vpop.eup %3987  ;;  %v1339_v57 = vld [vmem:[#allocation5 + $0x88] sm:$0xff] }
 0x555   :  { %v1247_v0 = vadd.f32 1.0, %v3988_v62 }
 0x556   :  { %3989 = vrcp.f32 %v1240_v61 }
 0x557   :  { %3991 = vrcp.f32 %v1247_v0 }
 0x560   :  { %v3990_v10 = vpop.eup %3989 }
 0x561   :  { %v3992_v16 = vpop.eup %3991 }
 0x562   :  { %v1323_v20 = vsub.f32 1.0, %v3992_v16  ;;  %v1325_v26 = vmul.f32 %v3992_v16, %v4527_v35 }
 0x564   :  { %v1316_v1 = vpop.f32.mrb[14].mxu0 }
 0x565   :  { %v1317_v3 = vadd.f32 %v4328_v49, %v1316_v1  ;;  %v3041_v6 = vpop.f32.mrb[15].mxu0 }
 0x567   :  { %v1320_v15 = vmul.f32 %v3990_v10, %v1317_v3 }
 0x569   :  { %v1321_v59 = vadd.f32 %v1320_v15, %v1095_v12  ;;  %v1577_v12 = vpop.permute.xlu1 %1576 }
 0x56a   :  { %vm1578_vm14 = vcmp.eq.s32.totalorder %v1577_v12, 1 }
 0x56b   :  { %3993 = vtanh.f32 %v1321_v59 }
 0x575   :  { %v3994_v21 = vpop.eup %3993 }
 0x576   :  { %v1324_v25 = vmul.f32 %v3994_v21, %v1323_v20  ;;  %v1583_v21 = vld [vmem:[#allocation5 + $0xa0] sm:$0xff] }
 0x578   :  { %v1326_v31 = vadd.f32 %v1325_v26, %v1324_v25 }
 0x57a   :  { %v4589_v32 = vsel %vm1334_vm13, %v1326_v31, %v4527_v35  ;;  %v1338_v35 = vld [vmem:[#allocation5 + $0x80] sm:$0xff] }
 0x57b   :  { %3075 = vmatmul.mubr.f32.vlgmr.msra.gmra.mrb[14].mxu1 %v4589_v32  ;;  %3110 = vmatmul.mubr.f32.vlgmr.msra.gmra.mrb[16].mxu0 %v4589_v32 }
 0x57c   :  { %3767 = vmatpush3.bf16.msra.mxu1 %v4248_v60  ;;  %3144 = vmatprep.mubr.msk.f32.mxu1 %vm4104_vm0, %v4105_v7 }
 0x57d   :  { %3768 = vmatprep.subr.bf16.mxu1 %v4103_v4  ;;  %3791 = vmatpush3.bf16.msra.mxu0 %v4166_v5 }
 0x57e   :  { %3792 = vmatprep.subr.bf16.mxu0 %v4103_v4  ;;  %3179 = vmatprep.mubr.msk.f32.mxu0 %vm4104_vm0, %v4105_v7 }
 0x580   :  { %3770 = vmatpush3.bf16.msra.mxu1 %v4255_v63 }
 0x581   :  { %3771 = vmatprep.subr.bf16.mxu1 %v4103_v4  ;;  %3794 = vmatpush3.bf16.msra.mxu0 %v4174_v8 }
 0x582   :  { %3795 = vmatprep.subr.bf16.mxu0 %v4103_v4 }
 0x584   :  { %3773 = vmatpush3.bf16.msra.mxu1 %v4266_v2 }
 0x585   :  { %3774 = vmatprep.subr.bf16.mxu1 %v4103_v4  ;;  %3797 = vmatpush3.bf16.msra.mxu0 %v4185_v18 }
 0x586   :  { %3798 = vmatprep.subr.bf16.mxu0 %v4103_v4 }
 0x588   :  { %3776 = vmatpush3.bf16.msra.mxu1 %v4272_v9 }
 0x589   :  { %3777 = vmatprep.subr.bf16.mxu1 %v4103_v4  ;;  %3800 = vmatpush3.bf16.msra.mxu0 %v4193_v24 }
 0x58a   :  { %3801 = vmatprep.subr.bf16.mxu0 %v4103_v4 }
 0x58c   :  { %3779 = vmatpush3.bf16.msra.mxu1 %v4278_v13 }
 0x58d   :  { %3780 = vmatprep.subr.bf16.mxu1 %v4103_v4  ;;  %3803 = vmatpush3.bf16.msra.mxu0 %v4201_v30 }
 0x58e   :  { %3804 = vmatprep.subr.bf16.mxu0 %v4103_v4 }
 0x590   :  { %3782 = vmatpush3.bf16.msra.mxu1 %v4284_v19 }
 0x591   :  { %3783 = vmatprep.subr.bf16.mxu1 %v4103_v4  ;;  %3806 = vmatpush3.bf16.msra.mxu0 %v4217_v38 }
 0x592   :  { %3807 = vmatprep.subr.bf16.mxu0 %v4103_v4 }
 0x594   :  { %3785 = vmatpush3.bf16.msra.mxu1 %v4290_v22 }
 0x595   :  { %3786 = vmatprep.subr.bf16.mxu1 %v4103_v4  ;;  %3809 = vmatpush3.bf16.msra.mxu0 %v4227_v45 }
 0x596   :  { %3810 = vmatprep.subr.bf16.mxu0 %v4103_v4 }
 0x598   :  { %3788 = vmatpush3.bf16.msra.mxu1 %v4296_v27 }
 0x599   :  { %3813 = vmatprep.subr.bf16.mxu1 %v4103_v4  ;;  %3812 = vmatpush3.bf16.msra.mxu0 %v4237_v52 }
 0x59a   :  { %3837 = vmatprep.subr.bf16.mxu0 %v4103_v4 }
 0x59b   :  { %3145 = vmatmul.mubr.f32.vlgmr.msra.gmra.mrb[16].mxu1 %v4589_v32 }
 0x59c   :  { %3815 = vmatpush3.bf16.msra.mxu1 %v4178_v14  ;;  %3214 = vmatprep.mubr.msk.f32.mxu1 %vm4104_vm0, %v4105_v7 }
 0x59d   :  { %3816 = vmatprep.subr.bf16.mxu1 %v4103_v4 }
 0x5a0   :  { %3818 = vmatpush3.bf16.msra.mxu1 %v4182_v17 }
 0x5a1   :  { %3819 = vmatprep.subr.bf16.mxu1 %v4103_v4 }
 0x5a4   :  { %3821 = vmatpush3.bf16.msra.mxu1 %v4190_v23 }
 0x5a5   :  { %3822 = vmatprep.subr.bf16.mxu1 %v4103_v4 }
 0x5a8   :  { %3824 = vmatpush3.bf16.msra.mxu1 %v4198_v29 }
 0x5a9   :  { %3825 = vmatprep.subr.bf16.mxu1 %v4103_v4 }
 0x5ac   :  { %3827 = vmatpush3.bf16.msra.mxu1 %v4212_v36 }
 0x5ad   :  { %3828 = vmatprep.subr.bf16.mxu1 %v4103_v4 }
 0x5b0   :  { %3830 = vmatpush3.bf16.msra.mxu1 %v4223_v44 }
 0x5b1   :  { %3831 = vmatprep.subr.bf16.mxu1 %v4103_v4 }
 0x5b4   :  { %3833 = vmatpush3.bf16.msra.mxu1 %v4233_v51 }
 0x5b5   :  { %3834 = vmatprep.subr.bf16.mxu1 %v4103_v4 }
 0x5b8   :  { %3836 = vmatpush3.bf16.msra.mxu1 %v4243_v58 }
 0x5b9   :  { %3861 = vmatprep.subr.bf16.mxu1 %v4103_v4 }
 0x64e   :  { %v1406_v34 = vpop.f32.mrb[14].mxu1  ;;  %v1476_v37 = vpop.f32.mrb[16].mxu0 }
 0x64f   :  { %v1480_v39 = vadd.f32 %v1406_v34, %v1337_v33  ;;  %v3076_v40 = vpop.f32.mrb[15].mxu1  ;;  %v3111_v41 = vpop.f32.mrb[17].mxu0  ;;  %v1487_v43 = vadd.f32 %v1476_v37, %v1338_v35 }
 0x650   :  { %v1821_v33 = vpop.permute.xlu0 %1820 }
 0x651   :  { %v2103_v42 = vmul.f32 -1.442695, %v1480_v39  ;;  %v2104_v46 = vmul.f32 -1.442695, %v1487_v43  ;;  %vm1822_vm15 = vcmp.eq.s32.totalorder %v1821_v33, 1 }
 0x653   :  { %3995 = vpow2.f32 %v2103_v42  ;;  %v1826_v42 = vld [vmem:[#allocation5 + $0xb0] sm:$0xff] }
 0x654   :  { %3997 = vpow2.f32 %v2104_v46 }
 0x65d   :  { %v3996_v11 = vpop.eup %3995 }
 0x65e   :  { %v1484_v47 = vadd.f32 1.0, %v3996_v11  ;;  %v3998_v48 = vpop.eup %3997 }
 0x65f   :  { %v1491_v50 = vadd.f32 1.0, %v3998_v48 }
 0x660   :  { %3999 = vrcp.f32 %v1484_v47 }
 0x661   :  { %4001 = vrcp.f32 %v1491_v50  ;;  %v1827_v50 = vld [vmem:[#allocation5 + $0xb8] sm:$0xff] }
 0x66a   :  { %v4000_v56 = vpop.eup %3999 }
 0x66b   :  { %v4002_v0 = vpop.eup %4001 }
 0x66c   :  { %v1567_v1 = vsub.f32 1.0, %v4002_v0  ;;  %v1569_v10 = vmul.f32 %v4002_v0, %v4589_v32 }
 0x66e   :  { %v1560_v53 = vpop.f32.mrb[16].mxu1 }
 0x66f   :  { %v1561_v54 = vadd.f32 %v4328_v49, %v1560_v53  ;;  %v3146_v55 = vpop.f32.mrb[17].mxu1 }
 0x671   :  { %v1564_v61 = vmul.f32 %v4000_v56, %v1561_v54 }
 0x673   :  { %v1565_v62 = vadd.f32 %v1564_v61, %v1339_v57  ;;  %v2065_v61 = vpop.permute.xlu1 %2064 }
 0x675   :  { %4003 = vtanh.f32 %v1565_v62 }
 0x67f   :  { %v4004_v3 = vpop.eup %4003 }
 0x680   :  { %v1568_v6 = vmul.f32 %v4004_v3, %v1567_v1 }
 0x682   :  { %v1570_v15 = vadd.f32 %v1569_v10, %v1568_v6 }
 0x684   :  { %v4651_v59 = vsel %vm1578_vm14, %v1570_v15, %v4589_v32 }
 0x685   :  { %3180 = vmatmul.mubr.f32.vlgmr.msra.gmra.mrb[18].mxu0 %v4651_v59  ;;  %3215 = vmatmul.mubr.f32.vlgmr.msra.gmra.mrb[18].mxu1 %v4651_v59 }
 0x686   :  { %3839 = vmatpush3.bf16.msra.mxu0 %v4248_v60  ;;  %3249 = vmatprep.mubr.msk.f32.mxu0 %vm4104_vm0, %v4105_v7 }
 0x687   :  { %3840 = vmatprep.subr.bf16.mxu0 %v4103_v4  ;;  %3863 = vmatpush3.bf16.msra.mxu1 %v4166_v5  ;;  %v1581_v5 = vld [vmem:[#allocation5 + $0x90] sm:$0xff] }
 0x688   :  { %3864 = vmatprep.subr.bf16.mxu1 %v4103_v4  ;;  %3284 = vmatprep.mubr.msk.f32.mxu1 %vm4104_vm0, %v4105_v7 }
 0x68a   :  { %3842 = vmatpush3.bf16.msra.mxu0 %v4255_v63 }
 0x68b   :  { %3843 = vmatprep.subr.bf16.mxu0 %v4103_v4  ;;  %3866 = vmatpush3.bf16.msra.mxu1 %v4174_v8 }
 0x68c   :  { %3867 = vmatprep.subr.bf16.mxu1 %v4103_v4 }
 0x68e   :  { %3845 = vmatpush3.bf16.msra.mxu0 %v4266_v2 }
 0x68f   :  { %3846 = vmatprep.subr.bf16.mxu0 %v4103_v4  ;;  %3869 = vmatpush3.bf16.msra.mxu1 %v4185_v18 }
 0x690   :  { %3870 = vmatprep.subr.bf16.mxu1 %v4103_v4 }
 0x692   :  { %3848 = vmatpush3.bf16.msra.mxu0 %v4272_v9 }
 0x693   :  { %3849 = vmatprep.subr.bf16.mxu0 %v4103_v4  ;;  %3872 = vmatpush3.bf16.msra.mxu1 %v4193_v24 }
 0x694   :  { %3873 = vmatprep.subr.bf16.mxu1 %v4103_v4 }
 0x696   :  { %3851 = vmatpush3.bf16.msra.mxu0 %v4278_v13 }
 0x697   :  { %3852 = vmatprep.subr.bf16.mxu0 %v4103_v4  ;;  %3875 = vmatpush3.bf16.msra.mxu1 %v4201_v30 }
 0x698   :  { %3876 = vmatprep.subr.bf16.mxu1 %v4103_v4 }
 0x69a   :  { %3854 = vmatpush3.bf16.msra.mxu0 %v4284_v19 }
 0x69b   :  { %3855 = vmatprep.subr.bf16.mxu0 %v4103_v4  ;;  %3878 = vmatpush3.bf16.msra.mxu1 %v4217_v38 }
 0x69c   :  { %3879 = vmatprep.subr.bf16.mxu1 %v4103_v4 }
 0x69e   :  { %3857 = vmatpush3.bf16.msra.mxu0 %v4290_v22 }
 0x69f   :  { %3858 = vmatprep.subr.bf16.mxu0 %v4103_v4  ;;  %3881 = vmatpush3.bf16.msra.mxu1 %v4227_v45 }
 0x6a0   :  { %3882 = vmatprep.subr.bf16.mxu1 %v4103_v4 }
 0x6a2   :  { %3860 = vmatpush3.bf16.msra.mxu0 %v4296_v27 }
 0x6a3   :  { %3885 = vmatprep.subr.bf16.mxu0 %v4103_v4  ;;  %3884 = vmatpush3.bf16.msra.mxu1 %v4237_v52 }
 0x6a4   :  { %3909 = vmatprep.subr.bf16.mxu1 %v4103_v4 }
 0x6a5   :  { %3250 = vmatmul.mubr.f32.vlgmr.msra.gmra.mrb[20].mxu0 %v4651_v59 }
 0x6a6   :  { %3887 = vmatpush3.bf16.msra.mxu0 %v4178_v14  ;;  %3319 = vmatprep.mubr.msk.f32.mxu0 %vm4104_vm0, %v4105_v7 }
 0x6a7   :  { %3888 = vmatprep.subr.bf16.mxu0 %v4103_v4 }
 0x6aa   :  { %3890 = vmatpush3.bf16.msra.mxu0 %v4182_v17 }
 0x6ab   :  { %3891 = vmatprep.subr.bf16.mxu0 %v4103_v4 }
 0x6ae   :  { %3893 = vmatpush3.bf16.msra.mxu0 %v4190_v23 }
 0x6af   :  { %3894 = vmatprep.subr.bf16.mxu0 %v4103_v4 }
 0x6b2   :  { %3896 = vmatpush3.bf16.msra.mxu0 %v4198_v29  ;;  %v1582_v29 = vld [vmem:[#allocation5 + $0x98] sm:$0xff] }
 0x6b3   :  { %3897 = vmatprep.subr.bf16.mxu0 %v4103_v4 }
 0x6b6   :  { %3899 = vmatpush3.bf16.msra.mxu0 %v4212_v36 }
 0x6b7   :  { %3900 = vmatprep.subr.bf16.mxu0 %v4103_v4 }
 0x6ba   :  { %3902 = vmatpush3.bf16.msra.mxu0 %v4223_v44 }
 0x6bb   :  { %3903 = vmatprep.subr.bf16.mxu0 %v4103_v4 }
 0x6be   :  { %3905 = vmatpush3.bf16.msra.mxu0 %v4233_v51 }
 0x6bf   :  { %3906 = vmatprep.subr.bf16.mxu0 %v4103_v4 }
 0x6c2   :  { %3908 = vmatpush3.bf16.msra.mxu0 %v4243_v58  ;;  %v4025_v58 = vld [vmem:[%s4747_s4] ss:$0 sm:$0xff] }
 0x758   :  { %v1650_v8 = vpop.f32.mrb[18].mxu0  ;;  %v1720_v14 = vpop.f32.mrb[18].mxu1 }
 0x759   :  { %v1724_v17 = vadd.f32 %v1650_v8, %v1581_v5  ;;  %v3181_v18 = vpop.f32.mrb[19].mxu0  ;;  %v3216_v23 = vpop.f32.mrb[19].mxu1  ;;  %v1731_v30 = vadd.f32 %v1720_v14, %v1582_v29 }
 0x75b   :  { %v2105_v24 = vmul.f32 -1.442695, %v1724_v17  ;;  %v2106_v36 = vmul.f32 -1.442695, %v1731_v30 }
 0x75d   :  { %4005 = vpow2.f32 %v2105_v24 }
 0x75e   :  { %4007 = vpow2.f32 %v2106_v36 }
 0x767   :  { %v4006_v38 = vpop.eup %4005 }
 0x768   :  { %v1728_v44 = vadd.f32 1.0, %v4006_v38  ;;  %v4008_v45 = vpop.eup %4007 }
 0x769   :  { %v1735_v51 = vadd.f32 1.0, %v4008_v45 }
 0x76a   :  { %4009 = vrcp.f32 %v1728_v44 }
 0x76b   :  { %4011 = vrcp.f32 %v1735_v51 }
 0x774   :  { %v4010_v20 = vpop.eup %4009 }
 0x775   :  { %v4012_v28 = vpop.eup %4011 }
 0x776   :  { %v1811_v31 = vsub.f32 1.0, %v4012_v28  ;;  %v1813_v37 = vmul.f32 %v4012_v28, %v4651_v59 }
 0x778   :  { %v1804_v52 = vpop.f32.mrb[20].mxu0 }
 0x779   :  { %v1805_v49 = vadd.f32 %v4025_v58, %v1804_v52  ;;  %v3251_v16 = vpop.f32.mrb[21].mxu0 }
 0x77b   :  { %v1808_v25 = vmul.f32 %v4010_v20, %v1805_v49 }
 0x77d   :  { %v1809_v26 = vadd.f32 %v1808_v25, %v1583_v21 }
 0x77f   :  { %4013 = vtanh.f32 %v1809_v26 }
 0x789   :  { %v4014_v32 = vpop.eup %4013 }
 0x78a   :  { %v1812_v34 = vmul.f32 %v4014_v32, %v1811_v31 }
 0x78c   :  { %v1814_v39 = vadd.f32 %v1813_v37, %v1812_v34 }
 0x78e   :  { %v1823_v40 = vsel %vm1822_vm15, %v1814_v39, %v4651_v59 }
 0x78f   :  { %3285 = vmatmul.mubr.f32.vlgmr.msra.gmra.mrb[20].mxu1 %v1823_v40  ;;  %3320 = vmatmul.mubr.f32.vlgmr.msra.gmra.mrb[22].mxu0 %v1823_v40 }
 0x790   :  { %3911 = vmatpush3.bf16.msra.mxu1 %v4248_v60  ;;  %3354 = vmatprep.mubr.msk.f32.mxu1 %vm4104_vm0, %v4105_v7  ;;  %v1825_v7 = vld [vmem:[#allocation5 + $0xa8] sm:$0xff]  ;;  %vm2066_vm0 = vcmp.eq.s32.totalorder %v2065_v61, 1 }
 0x791   :  { %3912 = vmatprep.subr.bf16.mxu1 %v4103_v4 }
 0x794   :  { %3914 = vmatpush3.bf16.msra.mxu1 %v4255_v63 }
 0x795   :  { %3915 = vmatprep.subr.bf16.mxu1 %v4103_v4 }
 0x798   :  { %3917 = vmatpush3.bf16.msra.mxu1 %v4266_v2 }
 0x799   :  { %3918 = vmatprep.subr.bf16.mxu1 %v4103_v4 }
 0x79c   :  { %3920 = vmatpush3.bf16.msra.mxu1 %v4272_v9 }
 0x79d   :  { %3921 = vmatprep.subr.bf16.mxu1 %v4103_v4 }
 0x7a0   :  { %3923 = vmatpush3.bf16.msra.mxu1 %v4278_v13 }
 0x7a1   :  { %3924 = vmatprep.subr.bf16.mxu1 %v4103_v4 }
 0x7a4   :  { %3926 = vmatpush3.bf16.msra.mxu1 %v4284_v19 }
 0x7a5   :  { %3927 = vmatprep.subr.bf16.mxu1 %v4103_v4 }
 0x7a8   :  { %3929 = vmatpush3.bf16.msra.mxu1 %v4290_v22 }
 0x7a9   :  { %3930 = vmatprep.subr.bf16.mxu1 %v4103_v4 }
 0x7ac   :  { %3932 = vmatpush3.bf16.msra.mxu1 %v4296_v27 }
 0x7af   :  { %3355 = vmatmul.mubr.f32.vlgmr.msra.gmra.mrb[22].mxu1 %v1823_v40 }
 0x862   :  { %v1894_v60 = vpop.f32.mrb[20].mxu1  ;;  %v1964_v63 = vpop.f32.mrb[22].mxu0 }
 0x863   :  { %v1968_v2 = vadd.f32 %v1894_v60, %v1825_v7  ;;  %v3286_v9 = vpop.f32.mrb[21].mxu1  ;;  %v3321_v41 = vpop.f32.mrb[23].mxu0  ;;  %v1975_v35 = vadd.f32 %v1964_v63, %v1826_v42 }
 0x865   :  { %v2107_v13 = vmul.f32 -1.442695, %v1968_v2  ;;  %v2108_v19 = vmul.f32 -1.442695, %v1975_v35 }
 0x867   :  { %4015 = vpow2.f32 %v2107_v13 }
 0x868   :  { %4017 = vpow2.f32 %v2108_v19 }
 0x871   :  { %v4016_v43 = vpop.eup %4015 }
 0x872   :  { %v1972_v46 = vadd.f32 1.0, %v4016_v43  ;;  %v4018_v22 = vpop.eup %4017 }
 0x873   :  { %v1979_v4 = vadd.f32 1.0, %v4018_v22 }
 0x874   :  { %4019 = vrcp.f32 %v1972_v46 }
 0x875   :  { %4021 = vrcp.f32 %v1979_v4 }
 0x87e   :  { %v4020_v48 = vpop.eup %4019 }
 0x87f   :  { %v4022_v55 = vpop.eup %4021 }
 0x880   :  { %v2055_v56 = vsub.f32 1.0, %v4022_v55  ;;  %v2057_v62 = vmul.f32 %v4022_v55, %v1823_v40 }
 0x882   :  { %v2048_v11 = vpop.f32.mrb[22].mxu1 }
 0x883   :  { %v2049_v27 = vadd.f32 %v4025_v58, %v2048_v11  ;;  %v3356_v47 = vpop.f32.mrb[23].mxu1 }
 0x885   :  { %v2052_v53 = vmul.f32 %v4020_v48, %v2049_v27 }
 0x887   :  { %v2053_v54 = vadd.f32 %v2052_v53, %v1827_v50 }
 0x889   :  { %4023 = vtanh.f32 %v2053_v54 }
 0x893   :  { %v4024_v57 = vpop.eup %4023 }
 0x894   :  { %v2056_v0 = vmul.f32 %v4024_v57, %v2055_v56 }
 0x896   :  { %v2058_v1 = vadd.f32 %v2057_v62, %v2056_v0 }
 0x898   :  { %v2067_v3 = vsel %vm2066_vm0, %v2058_v1, %v1823_v40 }
 0x899   :  { %2068 = vst [vmem:[#allocation2] sm:$0xff] %v2067_v3 }
 0x89a PF:  { %s4107_s4 = smov [#allocation10]  }
 0x89b   :  { %s2080_s23 = sshll.u32 %s4107_s4, 4  ;;  %s2081_s23 = int_to_ptr.vmem [resolvable:$true] %s2080_s23 }
 0x89c   :  { %s4070_s24 = scalar_lea.vmem %s2081_s23, 128  ;;  %p4075_p4 = scmp.lt.s32.totalorder %s2081_s23, %s2081_s23 }
 0x89d   :  { %p4071_p3 = scmp.ne.s32.totalorder %s2081_s23, %s4070_s24  ;;  %p4076_p5 = scmp.lt.s32.totalorder %s4070_s24, %s4070_s24 }
 0x89f   :  { %p4077_p6 = por %p4076_p5, %p4075_p4 }
 0x8a0   :  { %v2072_v6 = vld [vmem:[#allocation2] sm:$0xff] }
 0x8a1   :  { %2073 = vst [vmem:[#allocation10] sm:$0xff] %v2072_v6  ;;  %p4078_p7 = pnand %p4077_p6, %p4071_p3 }
 0x8a3   :  { %4081 = shalt.err (!%p4078_p7)
}
 0x8a4   :  { %s4082_s27 = scalar_lea.hbm %s4748_s5, 128 }
 0x8a5   :  { %p4083_p8 = scmp.ne.s32.totalorder %s4748_s5, %s4082_s27  ;;  %p4086_p9 = scmp.lt.u32.totalorder %s4082_s27, %s4748_s5 }
 0x8a7   :  { %p4088_p10 = pnand %p4086_p9, %p4083_p8 }
 0x8a9   :  { %4091 = shalt.err (!%p4088_p10)
}
 0x8aa   :  { %2083 = dma.vmem_to_hbm [thread:$0]  %s2081_s23, 128, %s4748_s5, [#allocation7]  }
 0x8ab   :  { %4096 = dma.done.wait [#allocation7], 128  }
 0x8ac   :  { %4097 = vsyncadd [#allocation7], 4294967168 }
 0x8ad   :  { %2087 = vsyncpa [#allocation6], 1 }
 0x8ae   :  { %2088 = vsyncpa [#allocation9], 1 }
 0x8af   :  { %2089 = vsyncpa [#allocation7], 1 }

</bundles_post_ra>
